<compile_context>
chip_gen: v6e
topology: v6e:2x2x1
jax: 0.10.0
libtpu: 0.0.40
codegen_flags: <defaults>
</compile_context>

<pallas_src>
import functools

import numpy as np
import jax
import jax.numpy as jnp
from jax import lax
from jax.experimental import pallas as pl
from jax.experimental.pallas import tpu as pltpu

_EPS = 1e-5


# ----------------------------- Pallas kernel ------------------------------

def _res_ghost_kernel(x_ref, w_ref, aux_ref, mask_ref, sel_ref, out_ref, pool_ref,
                      *, W, ic, cin, L):
    """One grid step processes NG samples folded along the lane axis (L = NG*H*W).

    x_ref   : (cin, L)         activations, lanes = flattened (sample, h, w)
    w_ref   : (4*ic, Kw)       primary 1x1 conv weights (BN-folded), row blocks:
                               [ghost1 | shortcut | ghost2@y_a1-half | ghost2@y_a2-half]
    aux_ref : (3*ic, 16)       cols 0:9 dw 3x3 weights, col 9 primary bias, col 10 cheap bias,
                               col 11 shortcut-BN scale, col 12 shortcut-BN bias
    mask_ref: (9, L)           0/1 boundary masks per 3x3 tap, tiled per sample
    sel_ref : (L, Lp)          0/1 block-diagonal 2x2-maxpool compaction matrix
    """
    f32 = jnp.float32
    x = x_ref[...]                                            # (cin, L)
    aux = aux_ref[...]                                        # (3*ic, 16)

    def dwconv(y, wd):
        """3x3 depthwise conv (padding=1) on y: (C, L), row-major flattened spatial.

        Spatial shifts via pltpu.roll on the lane axis (XLU); out-of-image / cross-sample
        taps are zeroed by the precomputed masks.  Center tap skips roll and mask.
        """
        acc = y * wd[:, 4:5]                                  # center tap, mask == 1
        k = 0
        for dh in (-1, 0, 1):
            for dw in (-1, 0, 1):
                if dh == 0 and dw == 0:
                    k += 1
                    continue
                off = dh * W + dw
                shifted = pltpu.roll(y, (-off) % L, axis=1)
                acc = acc + (shifted * mask_ref[k:k + 1, :]) * wd[:, k:k + 1]
                k += 1
        return acc

    def pool2x2(o):
        """Fused 2x2 max-pool on (C, L): roll-max over column/row pairs, then 0/1
        selection matmul (MXU) compacts to (C, Lp).  Wrap-around only touches
        non-selected positions (H, W even)."""
        cm = jnp.maximum(o, pltpu.roll(o, L - 1, axis=1))     # column pairs
        rm = jnp.maximum(cm, pltpu.roll(cm, L - W, axis=1))   # row pairs
        return jnp.dot(rm, sel_ref[...], preferred_element_type=f32)

    # --- stage A: ghost_conv1 primary + shortcut primary merged (both read x) ---
    w_prim = w_ref[0:2 * ic, 0:cin]                           # [W_ghost1 ; W_shortcut]
    pre_a = jnp.dot(w_prim, x, preferred_element_type=f32)    # (2*ic, L)
    y_a1 = jnp.maximum(pre_a + aux[0:2 * ic, 9:10], 0.0)
    y_a2 = jnp.maximum(dwconv(y_a1, aux[0:2 * ic, 0:9]) + aux[0:2 * ic, 10:11], 0.0)

    # --- ghost_conv2 primary: two accumulating dots on the halves (no concat of g1) ---
    pre_b = (jnp.dot(w_ref[2 * ic:3 * ic, 0:ic], y_a1[0:ic], preferred_element_type=f32)
             + jnp.dot(w_ref[3 * ic:4 * ic, 0:ic], y_a2[0:ic], preferred_element_type=f32))
    y_b1 = jnp.maximum(pre_b + aux[2 * ic:3 * ic, 9:10], 0.0)
    y_b2 = jnp.maximum(dwconv(y_b1, aux[2 * ic:3 * ic, 0:9]) + aux[2 * ic:3 * ic, 10:11], 0.0)

    # --- residual add with BatchNorm'd shortcut, written half-wise (no concats) ---
    out_lo = y_b1 + y_a1[ic:2 * ic] * aux[0:ic, 11:12] + aux[0:ic, 12:13]
    out_hi = y_b2 + y_a2[ic:2 * ic] * aux[ic:2 * ic, 11:12] + aux[ic:2 * ic, 12:13]
    out_ref[0:ic, :] = out_lo
    out_ref[ic:2 * ic, :] = out_hi

    # --- fused 2x2 max-pool, per half (lane-dense, unmasked stores when Lp >= 128) ---
    pool_ref[0:ic, :] = pool2x2(out_lo)
    pool_ref[ic:2 * ic, :] = pool2x2(out_hi)


# ------------------------------ parameter glue ------------------------------

def _ghost_params(key, cin, cout):
    ic = cout // 2
    k = jax.random.split(key, 10)
    u = lambda kk, shape, lo, hi: jax.random.uniform(kk, shape, jnp.float32, lo, hi)
    n = lambda kk, shape, s: s * jax.random.normal(kk, shape, jnp.float32)
    return dict(
        w1=n(k[0], (ic, cin, 1, 1), 0.3),                    # primary 1x1 conv, no bias
        g1=u(k[1], (ic,), 0.5, 1.5), be1=n(k[2], (ic,), 0.1),
        rm1=n(k[3], (ic,), 0.1),     rv1=u(k[4], (ic,), 0.5, 1.5),
        wd=n(k[5], (ic, 1, 3, 3), 0.3),                      # depthwise 3x3, groups=ic
        g2=u(k[6], (ic,), 0.5, 1.5), be2=n(k[7], (ic,), 0.1),
        rm2=n(k[8], (ic,), 0.1),     rv2=u(k[9], (ic,), 0.5, 1.5),
    )


def _fold_ghost(p):
    """Fold eval-mode BN into weights; return (C, ...)-layout operands."""
    ic = p['w1'].shape[0]
    s1 = p['g1'] / jnp.sqrt(p['rv1'] + _EPS)
    b1 = p['be1'] - p['rm1'] * s1
    s2 = p['g2'] / jnp.sqrt(p['rv2'] + _EPS)
    b2 = p['be2'] - p['rm2'] * s2
    w1 = p['w1'][:, :, 0, 0] * s1[:, None]                   # (ic, cin)
    wd = p['wd'][:, 0].reshape(ic, 9) * s2[:, None]          # (ic, 9), k = (dh+1)*3+(dw+1)
    return w1, b1, wd, b2


# ------------------------------- Pallas wrapper ------------------------------

def res_ghost_down_conv_pallas(x_nchw, params, num_groups=1):
    """num_groups=1 -> single grid step (best on v5e/v6e, 1 TensorCore per chip).
    num_groups=2 -> two 'parallel' steps so the work shards across v7x's 2 TCs."""
    N, Cin, H, W = x_nchw.shape
    assert H % 2 == 0 and W % 2 == 0, "fused 2x2 maxpool requires even H, W"
    assert N % num_groups == 0
    Cout = params['bn_g'].shape[0]
    ic = Cout // 2
    HW = H * W
    Hp, Wp = H // 2, W // 2
    HWp = Hp * Wp
    NG = N // num_groups                                      # samples per grid step
    L = NG * HW                                               # lane width per step
    Lp = NG * HWp

    w1_1, b1_1, wd_1, b2_1 = _fold_ghost(params['g1'])
    w1_2, b1_2, wd_2, b2_2 = _fold_ghost(params['g2'])
    w1_s, b1_s, wd_s, b2_s = _fold_ghost(params['gs'])
    ssc = params['bn_g'] / jnp.sqrt(params['bn_rv'] + _EPS)
    bsc = params['bn_b'] - params['bn_rm'] * ssc

    # ---- primary-conv weight slab: row blocks are all lane-0 aligned MXU operands ----
    Kw = max(Cin, ic)
    wslab = jnp.zeros((4 * ic, Kw), jnp.float32)
    wslab = wslab.at[0:ic, 0:Cin].set(w1_1)                   # ghost_conv1 primary
    wslab = wslab.at[ic:2 * ic, 0:Cin].set(w1_s)              # shortcut primary
    wslab = wslab.at[2 * ic:3 * ic, 0:ic].set(w1_2[:, 0:ic])  # ghost_conv2 @ y_a1 half
    wslab = wslab.at[3 * ic:4 * ic, 0:ic].set(w1_2[:, ic:2 * ic])  # ghost_conv2 @ y_a2 half

    # ---- aux slab: dw weights (cols 0:9), biases (9,10), shortcut BN (11,12) ----
    aux = jnp.zeros((3 * ic, 16), jnp.float32)
    aux = aux.at[0:ic, 0:9].set(wd_1).at[ic:2 * ic, 0:9].set(wd_s).at[2 * ic:3 * ic, 0:9].set(wd_2)
    aux = aux.at[0:ic, 9].set(b1_1).at[ic:2 * ic, 9].set(b1_s).at[2 * ic:3 * ic, 9].set(b1_2)
    aux = aux.at[0:ic, 10].set(b2_1).at[ic:2 * ic, 10].set(b2_s).at[2 * ic:3 * ic, 10].set(b2_2)
    aux = aux.at[0:2 * ic, 11].set(ssc).at[0:2 * ic, 12].set(bsc)

    # ---- host-precomputed constants: 3x3 boundary masks (tiled per sample) ----
    rows = np.arange(HW) // W
    cols = np.arange(HW) % W
    mask_np = np.zeros((9, HW), np.float32)
    k = 0
    for dh in (-1, 0, 1):
        for dw in (-1, 0, 1):
            mask_np[k] = (((rows + dh) >= 0) & ((rows + dh) < H) &
                          ((cols + dw) >= 0) & ((cols + dw) < W)).astype(np.float32)
            k += 1
    maskslab = jnp.asarray(np.tile(mask_np, (1, NG)))         # (9, L)

    # ---- 2x2 maxpool selection matrix, block-diagonal across the NG folded samples ----
    qs = np.arange(Lp)
    sn, sr = qs // HWp, qs % HWp
    src = sn * HW + 2 * (sr // Wp) * W + 2 * (sr % Wp)
    sel_np = np.zeros((L, Lp), np.float32)
    sel_np[src, qs] = 1.0
    sel = jnp.asarray(sel_np)

    # ---- batch folded into lanes: (N, C, H, W) -> (C, N*HW) (layout plumbing only) ----
    x_cnl = jnp.transpose(x_nchw, (1, 0, 2, 3)).reshape(Cin, N * HW)

    kernel = functools.partial(_res_ghost_kernel, W=W, ic=ic, cin=Cin, L=L)

    out_cnl, pool_cnl = pl.pallas_call(
        kernel,
        out_shape=(jax.ShapeDtypeStruct((Cout, N * HW), jnp.float32),
                   jax.ShapeDtypeStruct((Cout, N * HWp), jnp.float32)),
        grid_spec=pltpu.PrefetchScalarGridSpec(
            num_scalar_prefetch=0,
            grid=(num_groups,),
            in_specs=[
                pl.BlockSpec((Cin, L), lambda g: (0, g)),
                pl.BlockSpec((4 * ic, Kw), lambda g: (0, 0)),
                pl.BlockSpec((3 * ic, 16), lambda g: (0, 0)),
                pl.BlockSpec((9, L), lambda g: (0, 0)),
                pl.BlockSpec((L, Lp), lambda g: (0, 0)),
            ],
            out_specs=[
                pl.BlockSpec((Cout, L), lambda g: (0, g)),
                pl.BlockSpec((Cout, Lp), lambda g: (0, g)),
            ],
        ),
        # VMEM use is tiny at demo size; set vmem_limit_bytes explicitly when scaling H, W
        # (the pool-selection table is the first thing to blow v7x's 64 MiB VMEM).
        compiler_params=pltpu.CompilerParams(dimension_semantics=("parallel",)),
    )(x_cnl, wslab, aux, maskslab, sel)

    out = out_cnl.reshape(Cout, N, H, W).transpose(1, 0, 2, 3)
    pool = pool_cnl.reshape(Cout, N, Hp, Wp).transpose(1, 0, 2, 3)
    return out, pool


# ------------------------------ pure-JAX reference ---------------------------

def _ghost_ref(x, p):
    ic = p['w1'].shape[0]
    y1 = lax.conv_general_dilated(x, p['w1'], (1, 1), 'VALID',
                                  dimension_numbers=('NCHW', 'OIHW', 'NCHW'),
                                  precision=lax.Precision.HIGHEST)
    s1 = p['g1'] / jnp.sqrt(p['rv1'] + _EPS); b1 = p['be1'] - p['rm1'] * s1
    y1 = jax.nn.relu(y1 * s1[None, :, None, None] + b1[None, :, None, None])
    y2 = lax.conv_general_dilated(y1, p['wd'], (1, 1), ((1, 1), (1, 1)),
                                  dimension_numbers=('NCHW', 'OIHW', 'NCHW'),
                                  feature_group_count=ic,
                                  precision=lax.Precision.HIGHEST)
    s2 = p['g2'] / jnp.sqrt(p['rv2'] + _EPS); b2 = p['be2'] - p['rm2'] * s2
    y2 = jax.nn.relu(y2 * s2[None, :, None, None] + b2[None, :, None, None])
    return jnp.concatenate([y1, y2], axis=1)


def _ref_forward(x, params):
    out = _ghost_ref(x, params['g1'])
    out = _ghost_ref(out, params['g2'])
    sc = _ghost_ref(x, params['gs'])
    ssc = params['bn_g'] / jnp.sqrt(params['bn_rv'] + _EPS)
    bsc = params['bn_b'] - params['bn_rm'] * ssc
    sc = sc * ssc[None, :, None, None] + bsc[None, :, None, None]
    out = out + sc
    pool = lax.reduce_window(out, -jnp.inf, lax.max, (1, 1, 2, 2), (1, 1, 2, 2), 'VALID')
    return out, pool


# ------------------------------------ main -----------------------------------

if __name__ == "__main__":
    key = jax.random.PRNGKey(0)
    N, Cin, Cout, H, W = 2, 8, 16, 16, 16
    kx, k1, k2, k3, k4 = jax.random.split(key, 5)
    x = jax.random.normal(kx, (N, Cin, H, W), jnp.float32)

    params = {
        'g1': _ghost_params(k1, Cin, Cout),
        'g2': _ghost_params(k2, Cout, Cout),
        'gs': _ghost_params(k3, Cin, Cout),
    }
    kb = jax.random.split(k4, 4)
    params['bn_g'] = jax.random.uniform(kb[0], (Cout,), jnp.float32, 0.5, 1.5)
    params['bn_b'] = 0.1 * jax.random.normal(kb[1], (Cout,), jnp.float32)
    params['bn_rm'] = 0.1 * jax.random.normal(kb[2], (Cout,), jnp.float32)
    params['bn_rv'] = jax.random.uniform(kb[3], (Cout,), jnp.float32, 0.5, 1.5)

    out, pool = jax.jit(res_ghost_down_conv_pallas)(x, params)
    out = jax.block_until_ready(out)
    pool = jax.block_until_ready(pool)

    out_ref, pool_ref = _ref_forward(x, params)
    err_out = float(jnp.max(jnp.abs(out - out_ref)))
    err_pool = float(jnp.max(jnp.abs(pool - pool_ref)))
    assert out.shape == (N, Cout, H, W) and pool.shape == (N, Cout, H // 2, W // 2)
    assert err_out < 1e-3 and err_pool < 1e-3, (err_out, err_pool)
    print("KERNEL_OK")
</pallas_src>

<mosaic_0001>
module attributes {stable_mosaic.version = 11 : i64} {
  func.func @_res_ghost_kernel(%arg0: i32, %arg1: memref<8x512xf32, #tpu.memory_space<vmem>>, %arg2: memref<32x8xf32, #tpu.memory_space<vmem>>, %arg3: memref<24x16xf32, #tpu.memory_space<vmem>>, %arg4: memref<9x512xf32, #tpu.memory_space<vmem>>, %arg5: memref<512x128xf32, #tpu.memory_space<vmem>>, %arg6: memref<16x512xf32, #tpu.memory_space<vmem>>, %arg7: memref<16x128xf32, #tpu.memory_space<vmem>>) attributes {dimension_semantics = [#tpu.dimension_semantics<parallel>], iteration_bounds = array<i64: 1>, scalar_prefetch = 0 : i64, scratch_operands = 0 : i64, tpu.core_type = #tpu.core_type<tc>, window_params = [{transform_indices = @transform_0, window_bounds = array<i64: 8, 512>}, {pipeline_mode = #tpu.pipeline_mode<synchronous>, transform_indices = @transform_1, window_bounds = array<i64: 32, 8>}, {pipeline_mode = #tpu.pipeline_mode<synchronous>, transform_indices = @transform_2, window_bounds = array<i64: 24, 16>}, {pipeline_mode = #tpu.pipeline_mode<synchronous>, transform_indices = @transform_3, window_bounds = array<i64: 9, 512>}, {pipeline_mode = #tpu.pipeline_mode<synchronous>, transform_indices = @transform_4, window_bounds = array<i64: 512, 128>}, {transform_indices = @transform_5, window_bounds = array<i64: 16, 512>}, {transform_indices = @transform_6, window_bounds = array<i64: 16, 128>}]} {
    %c0 = arith.constant 0 : index
    %c0_0 = arith.constant 0 : index
    %0 = vector.load %arg1[%c0, %c0_0] : memref<8x512xf32, #tpu.memory_space<vmem>>, vector<8x512xf32>
    %c0_1 = arith.constant 0 : index
    %c0_2 = arith.constant 0 : index
    %1 = vector.load %arg3[%c0_1, %c0_2] : memref<24x16xf32, #tpu.memory_space<vmem>>, vector<24x16xf32>
    %c0_3 = arith.constant 0 : index
    %c0_4 = arith.constant 0 : index
    %2 = vector.load %arg2[%c0_3, %c0_4] : memref<32x8xf32, #tpu.memory_space<vmem>>, vector<16x8xf32>
    %cst = arith.constant dense<0.000000e+00> : vector<16x512xf32>
    %3 = tpu.matmul %2, %0, %cst {dimension_numbers = #tpu.dot_dimension_numbers<[1], [0], [0], [1], [0, 0, 1, 1], [], []>} : vector<16x8xf32>, vector<8x512xf32>, vector<16x512xf32> -> vector<16x512xf32>
    %4 = vector.extract_strided_slice %1 {offsets = [0, 9], sizes = [16, 1], strides = [1, 1]} : vector<24x16xf32> to vector<16x1xf32>
    %5 = vector.broadcast %4 : vector<16x1xf32> to vector<16x512xf32>
    %6 = arith.addf %3, %5 : vector<16x512xf32>
    %cst_5 = arith.constant 0.000000e+00 : f32
    %7 = vector.broadcast %cst_5 : f32 to vector<16x512xf32>
    %8 = arith.maximumf %6, %7 : vector<16x512xf32>
    %9 = vector.extract_strided_slice %1 {offsets = [0, 0], sizes = [16, 9], strides = [1, 1]} : vector<24x16xf32> to vector<16x9xf32>
    %10 = vector.extract_strided_slice %9 {offsets = [0, 4], sizes = [16, 1], strides = [1, 1]} : vector<16x9xf32> to vector<16x1xf32>
    %11 = vector.broadcast %10 : vector<16x1xf32> to vector<16x512xf32>
    %12 = arith.mulf %8, %11 : vector<16x512xf32>
    %c17_i32 = arith.constant 17 : i32
    %13 = tpu.dynamic_rotate %8 by %c17_i32 dim 1 : vector<16x512xf32>, i32 -> vector<16x512xf32>
    %c0_6 = arith.constant 0 : index
    %c0_7 = arith.constant 0 : index
    %14 = vector.load %arg4[%c0_6, %c0_7] : memref<9x512xf32, #tpu.memory_space<vmem>>, vector<1x512xf32>
    %15 = vector.broadcast %14 : vector<1x512xf32> to vector<16x512xf32>
    %16 = arith.mulf %13, %15 : vector<16x512xf32>
    %17 = vector.extract_strided_slice %9 {offsets = [0, 0], sizes = [16, 1], strides = [1, 1]} : vector<16x9xf32> to vector<16x1xf32>
    %18 = vector.broadcast %17 : vector<16x1xf32> to vector<16x512xf32>
    %19 = arith.mulf %16, %18 : vector<16x512xf32>
    %20 = arith.addf %12, %19 : vector<16x512xf32>
    %c16_i32 = arith.constant 16 : i32
    %21 = tpu.dynamic_rotate %8 by %c16_i32 dim 1 : vector<16x512xf32>, i32 -> vector<16x512xf32>
    %c1 = arith.constant 1 : index
    %c0_8 = arith.constant 0 : index
    %22 = vector.load %arg4[%c1, %c0_8] : memref<9x512xf32, #tpu.memory_space<vmem>>, vector<1x512xf32>
    %23 = vector.broadcast %22 : vector<1x512xf32> to vector<16x512xf32>
    %24 = arith.mulf %21, %23 : vector<16x512xf32>
    %25 = vector.extract_strided_slice %9 {offsets = [0, 1], sizes = [16, 1], strides = [1, 1]} : vector<16x9xf32> to vector<16x1xf32>
    %26 = vector.broadcast %25 : vector<16x1xf32> to vector<16x512xf32>
    %27 = arith.mulf %24, %26 : vector<16x512xf32>
    %28 = arith.addf %20, %27 : vector<16x512xf32>
    %c15_i32 = arith.constant 15 : i32
    %29 = tpu.dynamic_rotate %8 by %c15_i32 dim 1 : vector<16x512xf32>, i32 -> vector<16x512xf32>
    %c2 = arith.constant 2 : index
    %c0_9 = arith.constant 0 : index
    %30 = vector.load %arg4[%c2, %c0_9] : memref<9x512xf32, #tpu.memory_space<vmem>>, vector<1x512xf32>
    %31 = vector.broadcast %30 : vector<1x512xf32> to vector<16x512xf32>
    %32 = arith.mulf %29, %31 : vector<16x512xf32>
    %33 = vector.extract_strided_slice %9 {offsets = [0, 2], sizes = [16, 1], strides = [1, 1]} : vector<16x9xf32> to vector<16x1xf32>
    %34 = vector.broadcast %33 : vector<16x1xf32> to vector<16x512xf32>
    %35 = arith.mulf %32, %34 : vector<16x512xf32>
    %36 = arith.addf %28, %35 : vector<16x512xf32>
    %c1_i32 = arith.constant 1 : i32
    %37 = tpu.dynamic_rotate %8 by %c1_i32 dim 1 : vector<16x512xf32>, i32 -> vector<16x512xf32>
    %c3 = arith.constant 3 : index
    %c0_10 = arith.constant 0 : index
    %38 = vector.load %arg4[%c3, %c0_10] : memref<9x512xf32, #tpu.memory_space<vmem>>, vector<1x512xf32>
    %39 = vector.broadcast %38 : vector<1x512xf32> to vector<16x512xf32>
    %40 = arith.mulf %37, %39 : vector<16x512xf32>
    %41 = vector.extract_strided_slice %9 {offsets = [0, 3], sizes = [16, 1], strides = [1, 1]} : vector<16x9xf32> to vector<16x1xf32>
    %42 = vector.broadcast %41 : vector<16x1xf32> to vector<16x512xf32>
    %43 = arith.mulf %40, %42 : vector<16x512xf32>
    %44 = arith.addf %36, %43 : vector<16x512xf32>
    %c511_i32 = arith.constant 511 : i32
    %45 = tpu.dynamic_rotate %8 by %c511_i32 dim 1 : vector<16x512xf32>, i32 -> vector<16x512xf32>
    %c5 = arith.constant 5 : index
    %c0_11 = arith.constant 0 : index
    %46 = vector.load %arg4[%c5, %c0_11] : memref<9x512xf32, #tpu.memory_space<vmem>>, vector<1x512xf32>
    %47 = vector.broadcast %46 : vector<1x512xf32> to vector<16x512xf32>
    %48 = arith.mulf %45, %47 : vector<16x512xf32>
    %49 = vector.extract_strided_slice %9 {offsets = [0, 5], sizes = [16, 1], strides = [1, 1]} : vector<16x9xf32> to vector<16x1xf32>
    %50 = vector.broadcast %49 : vector<16x1xf32> to vector<16x512xf32>
    %51 = arith.mulf %48, %50 : vector<16x512xf32>
    %52 = arith.addf %44, %51 : vector<16x512xf32>
    %c497_i32 = arith.constant 497 : i32
    %53 = tpu.dynamic_rotate %8 by %c497_i32 dim 1 : vector<16x512xf32>, i32 -> vector<16x512xf32>
    %c6 = arith.constant 6 : index
    %c0_12 = arith.constant 0 : index
    %54 = vector.load %arg4[%c6, %c0_12] : memref<9x512xf32, #tpu.memory_space<vmem>>, vector<1x512xf32>
    %55 = vector.broadcast %54 : vector<1x512xf32> to vector<16x512xf32>
    %56 = arith.mulf %53, %55 : vector<16x512xf32>
    %57 = vector.extract_strided_slice %9 {offsets = [0, 6], sizes = [16, 1], strides = [1, 1]} : vector<16x9xf32> to vector<16x1xf32>
    %58 = vector.broadcast %57 : vector<16x1xf32> to vector<16x512xf32>
    %59 = arith.mulf %56, %58 : vector<16x512xf32>
    %60 = arith.addf %52, %59 : vector<16x512xf32>
    %c496_i32 = arith.constant 496 : i32
    %61 = tpu.dynamic_rotate %8 by %c496_i32 dim 1 : vector<16x512xf32>, i32 -> vector<16x512xf32>
    %c7 = arith.constant 7 : index
    %c0_13 = arith.constant 0 : index
    %62 = vector.load %arg4[%c7, %c0_13] : memref<9x512xf32, #tpu.memory_space<vmem>>, vector<1x512xf32>
    %63 = vector.broadcast %62 : vector<1x512xf32> to vector<16x512xf32>
    %64 = arith.mulf %61, %63 : vector<16x512xf32>
    %65 = vector.extract_strided_slice %9 {offsets = [0, 7], sizes = [16, 1], strides = [1, 1]} : vector<16x9xf32> to vector<16x1xf32>
    %66 = vector.broadcast %65 : vector<16x1xf32> to vector<16x512xf32>
    %67 = arith.mulf %64, %66 : vector<16x512xf32>
    %68 = arith.addf %60, %67 : vector<16x512xf32>
    %c495_i32 = arith.constant 495 : i32
    %69 = tpu.dynamic_rotate %8 by %c495_i32 dim 1 : vector<16x512xf32>, i32 -> vector<16x512xf32>
    %c8 = arith.constant 8 : index
    %c0_14 = arith.constant 0 : index
    %70 = vector.load %arg4[%c8, %c0_14] : memref<9x512xf32, #tpu.memory_space<vmem>>, vector<1x512xf32>
    %71 = vector.broadcast %70 : vector<1x512xf32> to vector<16x512xf32>
    %72 = arith.mulf %69, %71 : vector<16x512xf32>
    %73 = vector.extract_strided_slice %9 {offsets = [0, 8], sizes = [16, 1], strides = [1, 1]} : vector<16x9xf32> to vector<16x1xf32>
    %74 = vector.broadcast %73 : vector<16x1xf32> to vector<16x512xf32>
    %75 = arith.mulf %72, %74 : vector<16x512xf32>
    %76 = arith.addf %68, %75 : vector<16x512xf32>
    %77 = vector.extract_strided_slice %1 {offsets = [0, 10], sizes = [16, 1], strides = [1, 1]} : vector<24x16xf32> to vector<16x1xf32>
    %78 = vector.broadcast %77 : vector<16x1xf32> to vector<16x512xf32>
    %79 = arith.addf %76, %78 : vector<16x512xf32>
    %cst_15 = arith.constant 0.000000e+00 : f32
    %80 = vector.broadcast %cst_15 : f32 to vector<16x512xf32>
    %81 = arith.maximumf %79, %80 : vector<16x512xf32>
    %c16 = arith.constant 16 : index
    %c0_16 = arith.constant 0 : index
    %82 = vector.load %arg2[%c16, %c0_16] : memref<32x8xf32, #tpu.memory_space<vmem>>, vector<8x8xf32>
    %83 = vector.extract_strided_slice %8 {offsets = [0, 0], sizes = [8, 512], strides = [1, 1]} : vector<16x512xf32> to vector<8x512xf32>
    %cst_17 = arith.constant dense<0.000000e+00> : vector<8x512xf32>
    %84 = tpu.matmul %82, %83, %cst_17 {dimension_numbers = #tpu.dot_dimension_numbers<[1], [0], [0], [1], [0, 0, 1, 1], [], []>} : vector<8x8xf32>, vector<8x512xf32>, vector<8x512xf32> -> vector<8x512xf32>
    %c24 = arith.constant 24 : index
    %c0_18 = arith.constant 0 : index
    %85 = vector.load %arg2[%c24, %c0_18] : memref<32x8xf32, #tpu.memory_space<vmem>>, vector<8x8xf32>
    %86 = vector.extract_strided_slice %81 {offsets = [0, 0], sizes = [8, 512], strides = [1, 1]} : vector<16x512xf32> to vector<8x512xf32>
    %cst_19 = arith.constant dense<0.000000e+00> : vector<8x512xf32>
    %87 = tpu.matmul %85, %86, %cst_19 {dimension_numbers = #tpu.dot_dimension_numbers<[1], [0], [0], [1], [0, 0, 1, 1], [], []>} : vector<8x8xf32>, vector<8x512xf32>, vector<8x512xf32> -> vector<8x512xf32>
    %88 = arith.addf %84, %87 : vector<8x512xf32>
    %89 = vector.extract_strided_slice %1 {offsets = [16, 9], sizes = [8, 1], strides = [1, 1]} : vector<24x16xf32> to vector<8x1xf32>
    %90 = vector.broadcast %89 : vector<8x1xf32> to vector<8x512xf32>
    %91 = arith.addf %88, %90 : vector<8x512xf32>
    %cst_20 = arith.constant 0.000000e+00 : f32
    %92 = vector.broadcast %cst_20 : f32 to vector<8x512xf32>
    %93 = arith.maximumf %91, %92 : vector<8x512xf32>
    %94 = vector.extract_strided_slice %1 {offsets = [16, 0], sizes = [8, 9], strides = [1, 1]} : vector<24x16xf32> to vector<8x9xf32>
    %95 = vector.extract_strided_slice %94 {offsets = [0, 4], sizes = [8, 1], strides = [1, 1]} : vector<8x9xf32> to vector<8x1xf32>
    %96 = vector.broadcast %95 : vector<8x1xf32> to vector<8x512xf32>
    %97 = arith.mulf %93, %96 : vector<8x512xf32>
    %c17_i32_21 = arith.constant 17 : i32
    %98 = tpu.dynamic_rotate %93 by %c17_i32_21 dim 1 : vector<8x512xf32>, i32 -> vector<8x512xf32>
    %c0_22 = arith.constant 0 : index
    %c0_23 = arith.constant 0 : index
    %99 = vector.load %arg4[%c0_22, %c0_23] : memref<9x512xf32, #tpu.memory_space<vmem>>, vector<1x512xf32>
    %100 = vector.broadcast %99 : vector<1x512xf32> to vector<8x512xf32>
    %101 = arith.mulf %98, %100 : vector<8x512xf32>
    %102 = vector.extract_strided_slice %94 {offsets = [0, 0], sizes = [8, 1], strides = [1, 1]} : vector<8x9xf32> to vector<8x1xf32>
    %103 = vector.broadcast %102 : vector<8x1xf32> to vector<8x512xf32>
    %104 = arith.mulf %101, %103 : vector<8x512xf32>
    %105 = arith.addf %97, %104 : vector<8x512xf32>
    %c16_i32_24 = arith.constant 16 : i32
    %106 = tpu.dynamic_rotate %93 by %c16_i32_24 dim 1 : vector<8x512xf32>, i32 -> vector<8x512xf32>
    %c1_25 = arith.constant 1 : index
    %c0_26 = arith.constant 0 : index
    %107 = vector.load %arg4[%c1_25, %c0_26] : memref<9x512xf32, #tpu.memory_space<vmem>>, vector<1x512xf32>
    %108 = vector.broadcast %107 : vector<1x512xf32> to vector<8x512xf32>
    %109 = arith.mulf %106, %108 : vector<8x512xf32>
    %110 = vector.extract_strided_slice %94 {offsets = [0, 1], sizes = [8, 1], strides = [1, 1]} : vector<8x9xf32> to vector<8x1xf32>
    %111 = vector.broadcast %110 : vector<8x1xf32> to vector<8x512xf32>
    %112 = arith.mulf %109, %111 : vector<8x512xf32>
    %113 = arith.addf %105, %112 : vector<8x512xf32>
    %c15_i32_27 = arith.constant 15 : i32
    %114 = tpu.dynamic_rotate %93 by %c15_i32_27 dim 1 : vector<8x512xf32>, i32 -> vector<8x512xf32>
    %c2_28 = arith.constant 2 : index
    %c0_29 = arith.constant 0 : index
    %115 = vector.load %arg4[%c2_28, %c0_29] : memref<9x512xf32, #tpu.memory_space<vmem>>, vector<1x512xf32>
    %116 = vector.broadcast %115 : vector<1x512xf32> to vector<8x512xf32>
    %117 = arith.mulf %114, %116 : vector<8x512xf32>
    %118 = vector.extract_strided_slice %94 {offsets = [0, 2], sizes = [8, 1], strides = [1, 1]} : vector<8x9xf32> to vector<8x1xf32>
    %119 = vector.broadcast %118 : vector<8x1xf32> to vector<8x512xf32>
    %120 = arith.mulf %117, %119 : vector<8x512xf32>
    %121 = arith.addf %113, %120 : vector<8x512xf32>
    %c1_i32_30 = arith.constant 1 : i32
    %122 = tpu.dynamic_rotate %93 by %c1_i32_30 dim 1 : vector<8x512xf32>, i32 -> vector<8x512xf32>
    %c3_31 = arith.constant 3 : index
    %c0_32 = arith.constant 0 : index
    %123 = vector.load %arg4[%c3_31, %c0_32] : memref<9x512xf32, #tpu.memory_space<vmem>>, vector<1x512xf32>
    %124 = vector.broadcast %123 : vector<1x512xf32> to vector<8x512xf32>
    %125 = arith.mulf %122, %124 : vector<8x512xf32>
    %126 = vector.extract_strided_slice %94 {offsets = [0, 3], sizes = [8, 1], strides = [1, 1]} : vector<8x9xf32> to vector<8x1xf32>
    %127 = vector.broadcast %126 : vector<8x1xf32> to vector<8x512xf32>
    %128 = arith.mulf %125, %127 : vector<8x512xf32>
    %129 = arith.addf %121, %128 : vector<8x512xf32>
    %c511_i32_33 = arith.constant 511 : i32
    %130 = tpu.dynamic_rotate %93 by %c511_i32_33 dim 1 : vector<8x512xf32>, i32 -> vector<8x512xf32>
    %c5_34 = arith.constant 5 : index
    %c0_35 = arith.constant 0 : index
    %131 = vector.load %arg4[%c5_34, %c0_35] : memref<9x512xf32, #tpu.memory_space<vmem>>, vector<1x512xf32>
    %132 = vector.broadcast %131 : vector<1x512xf32> to vector<8x512xf32>
    %133 = arith.mulf %130, %132 : vector<8x512xf32>
    %134 = vector.extract_strided_slice %94 {offsets = [0, 5], sizes = [8, 1], strides = [1, 1]} : vector<8x9xf32> to vector<8x1xf32>
    %135 = vector.broadcast %134 : vector<8x1xf32> to vector<8x512xf32>
    %136 = arith.mulf %133, %135 : vector<8x512xf32>
    %137 = arith.addf %129, %136 : vector<8x512xf32>
    %c497_i32_36 = arith.constant 497 : i32
    %138 = tpu.dynamic_rotate %93 by %c497_i32_36 dim 1 : vector<8x512xf32>, i32 -> vector<8x512xf32>
    %c6_37 = arith.constant 6 : index
    %c0_38 = arith.constant 0 : index
    %139 = vector.load %arg4[%c6_37, %c0_38] : memref<9x512xf32, #tpu.memory_space<vmem>>, vector<1x512xf32>
    %140 = vector.broadcast %139 : vector<1x512xf32> to vector<8x512xf32>
    %141 = arith.mulf %138, %140 : vector<8x512xf32>
    %142 = vector.extract_strided_slice %94 {offsets = [0, 6], sizes = [8, 1], strides = [1, 1]} : vector<8x9xf32> to vector<8x1xf32>
    %143 = vector.broadcast %142 : vector<8x1xf32> to vector<8x512xf32>
    %144 = arith.mulf %141, %143 : vector<8x512xf32>
    %145 = arith.addf %137, %144 : vector<8x512xf32>
    %c496_i32_39 = arith.constant 496 : i32
    %146 = tpu.dynamic_rotate %93 by %c496_i32_39 dim 1 : vector<8x512xf32>, i32 -> vector<8x512xf32>
    %c7_40 = arith.constant 7 : index
    %c0_41 = arith.constant 0 : index
    %147 = vector.load %arg4[%c7_40, %c0_41] : memref<9x512xf32, #tpu.memory_space<vmem>>, vector<1x512xf32>
    %148 = vector.broadcast %147 : vector<1x512xf32> to vector<8x512xf32>
    %149 = arith.mulf %146, %148 : vector<8x512xf32>
    %150 = vector.extract_strided_slice %94 {offsets = [0, 7], sizes = [8, 1], strides = [1, 1]} : vector<8x9xf32> to vector<8x1xf32>
    %151 = vector.broadcast %150 : vector<8x1xf32> to vector<8x512xf32>
    %152 = arith.mulf %149, %151 : vector<8x512xf32>
    %153 = arith.addf %145, %152 : vector<8x512xf32>
    %c495_i32_42 = arith.constant 495 : i32
    %154 = tpu.dynamic_rotate %93 by %c495_i32_42 dim 1 : vector<8x512xf32>, i32 -> vector<8x512xf32>
    %c8_43 = arith.constant 8 : index
    %c0_44 = arith.constant 0 : index
    %155 = vector.load %arg4[%c8_43, %c0_44] : memref<9x512xf32, #tpu.memory_space<vmem>>, vector<1x512xf32>
    %156 = vector.broadcast %155 : vector<1x512xf32> to vector<8x512xf32>
    %157 = arith.mulf %154, %156 : vector<8x512xf32>
    %158 = vector.extract_strided_slice %94 {offsets = [0, 8], sizes = [8, 1], strides = [1, 1]} : vector<8x9xf32> to vector<8x1xf32>
    %159 = vector.broadcast %158 : vector<8x1xf32> to vector<8x512xf32>
    %160 = arith.mulf %157, %159 : vector<8x512xf32>
    %161 = arith.addf %153, %160 : vector<8x512xf32>
    %162 = vector.extract_strided_slice %1 {offsets = [16, 10], sizes = [8, 1], strides = [1, 1]} : vector<24x16xf32> to vector<8x1xf32>
    %163 = vector.broadcast %162 : vector<8x1xf32> to vector<8x512xf32>
    %164 = arith.addf %161, %163 : vector<8x512xf32>
    %cst_45 = arith.constant 0.000000e+00 : f32
    %165 = vector.broadcast %cst_45 : f32 to vector<8x512xf32>
    %166 = arith.maximumf %164, %165 : vector<8x512xf32>
    %167 = vector.extract_strided_slice %8 {offsets = [8, 0], sizes = [8, 512], strides = [1, 1]} : vector<16x512xf32> to vector<8x512xf32>
    %168 = vector.extract_strided_slice %1 {offsets = [0, 11], sizes = [8, 1], strides = [1, 1]} : vector<24x16xf32> to vector<8x1xf32>
    %169 = vector.broadcast %168 : vector<8x1xf32> to vector<8x512xf32>
    %170 = arith.mulf %167, %169 : vector<8x512xf32>
    %171 = arith.addf %93, %170 : vector<8x512xf32>
    %172 = vector.extract_strided_slice %1 {offsets = [0, 12], sizes = [8, 1], strides = [1, 1]} : vector<24x16xf32> to vector<8x1xf32>
    %173 = vector.broadcast %172 : vector<8x1xf32> to vector<8x512xf32>
    %174 = arith.addf %171, %173 : vector<8x512xf32>
    %175 = vector.extract_strided_slice %81 {offsets = [8, 0], sizes = [8, 512], strides = [1, 1]} : vector<16x512xf32> to vector<8x512xf32>
    %176 = vector.extract_strided_slice %1 {offsets = [8, 11], sizes = [8, 1], strides = [1, 1]} : vector<24x16xf32> to vector<8x1xf32>
    %177 = vector.broadcast %176 : vector<8x1xf32> to vector<8x512xf32>
    %178 = arith.mulf %175, %177 : vector<8x512xf32>
    %179 = arith.addf %166, %178 : vector<8x512xf32>
    %180 = vector.extract_strided_slice %1 {offsets = [8, 12], sizes = [8, 1], strides = [1, 1]} : vector<24x16xf32> to vector<8x1xf32>
    %181 = vector.broadcast %180 : vector<8x1xf32> to vector<8x512xf32>
    %182 = arith.addf %179, %181 : vector<8x512xf32>
    %c0_46 = arith.constant 0 : index
    %c0_47 = arith.constant 0 : index
    %183 = vector.load %arg6[%c0_46, %c0_47] : memref<16x512xf32, #tpu.memory_space<vmem>>, vector<8x512xf32>
    tpu.vector_store %arg6[%c0_46, %c0_47], %174 {strides = array<i32>} : memref<16x512xf32, #tpu.memory_space<vmem>>, vector<8x512xf32>,
    %c8_48 = arith.constant 8 : index
    %c0_49 = arith.constant 0 : index
    %184 = vector.load %arg6[%c8_48, %c0_49] : memref<16x512xf32, #tpu.memory_space<vmem>>, vector<8x512xf32>
    tpu.vector_store %arg6[%c8_48, %c0_49], %182 {strides = array<i32>} : memref<16x512xf32, #tpu.memory_space<vmem>>, vector<8x512xf32>,
    %c511_i32_50 = arith.constant 511 : i32
    %185 = tpu.dynamic_rotate %174 by %c511_i32_50 dim 1 : vector<8x512xf32>, i32 -> vector<8x512xf32>
    %186 = arith.maximumf %174, %185 : vector<8x512xf32>
    %c496_i32_51 = arith.constant 496 : i32
    %187 = tpu.dynamic_rotate %186 by %c496_i32_51 dim 1 : vector<8x512xf32>, i32 -> vector<8x512xf32>
    %188 = arith.maximumf %186, %187 : vector<8x512xf32>
    %c0_52 = arith.constant 0 : index
    %c0_53 = arith.constant 0 : index
    %189 = vector.load %arg5[%c0_52, %c0_53] : memref<512x128xf32, #tpu.memory_space<vmem>>, vector<512x128xf32>
    %cst_54 = arith.constant dense<0.000000e+00> : vector<8x128xf32>
    %190 = tpu.matmul %188, %189, %cst_54 {dimension_numbers = #tpu.dot_dimension_numbers<[1], [0], [0], [1], [0, 0, 1, 1], [], []>} : vector<8x512xf32>, vector<512x128xf32>, vector<8x128xf32> -> vector<8x128xf32>
    %c0_55 = arith.constant 0 : index
    %c0_56 = arith.constant 0 : index
    %191 = vector.load %arg7[%c0_55, %c0_56] : memref<16x128xf32, #tpu.memory_space<vmem>>, vector<8x128xf32>
    tpu.vector_store %arg7[%c0_55, %c0_56], %190 {strides = array<i32>} : memref<16x128xf32, #tpu.memory_space<vmem>>, vector<8x128xf32>,
    %c511_i32_57 = arith.constant 511 : i32
    %192 = tpu.dynamic_rotate %182 by %c511_i32_57 dim 1 : vector<8x512xf32>, i32 -> vector<8x512xf32>
    %193 = arith.maximumf %182, %192 : vector<8x512xf32>
    %c496_i32_58 = arith.constant 496 : i32
    %194 = tpu.dynamic_rotate %193 by %c496_i32_58 dim 1 : vector<8x512xf32>, i32 -> vector<8x512xf32>
    %195 = arith.maximumf %193, %194 : vector<8x512xf32>
    %c0_59 = arith.constant 0 : index
    %c0_60 = arith.constant 0 : index
    %196 = vector.load %arg5[%c0_59, %c0_60] : memref<512x128xf32, #tpu.memory_space<vmem>>, vector<512x128xf32>
    %cst_61 = arith.constant dense<0.000000e+00> : vector<8x128xf32>
    %197 = tpu.matmul %195, %196, %cst_61 {dimension_numbers = #tpu.dot_dimension_numbers<[1], [0], [0], [1], [0, 0, 1, 1], [], []>} : vector<8x512xf32>, vector<512x128xf32>, vector<8x128xf32> -> vector<8x128xf32>
    %c8_62 = arith.constant 8 : index
    %c0_63 = arith.constant 0 : index
    %198 = vector.load %arg7[%c8_62, %c0_63] : memref<16x128xf32, #tpu.memory_space<vmem>>, vector<8x128xf32>
    tpu.vector_store %arg7[%c8_62, %c0_63], %197 {strides = array<i32>} : memref<16x128xf32, #tpu.memory_space<vmem>>, vector<8x128xf32>,
    return
  }
  func.func @transform_0(%arg0: i32) -> (i32, i32) {
    %c0_i32 = arith.constant 0 : i32
    %c0_i32_0 = arith.constant 0 : i32
    return %c0_i32, %arg0 : i32, i32
  }
  func.func @transform_1(%arg0: i32) -> (i32, i32) {
    %c0_i32 = arith.constant 0 : i32
    %c0_i32_0 = arith.constant 0 : i32
    %c0_i32_1 = arith.constant 0 : i32
    return %c0_i32, %c0_i32_0 : i32, i32
  }
  func.func @transform_2(%arg0: i32) -> (i32, i32) {
    %c0_i32 = arith.constant 0 : i32
    %c0_i32_0 = arith.constant 0 : i32
    %c0_i32_1 = arith.constant 0 : i32
    return %c0_i32, %c0_i32_0 : i32, i32
  }
  func.func @transform_3(%arg0: i32) -> (i32, i32) {
    %c0_i32 = arith.constant 0 : i32
    %c0_i32_0 = arith.constant 0 : i32
    %c0_i32_1 = arith.constant 0 : i32
    return %c0_i32, %c0_i32_0 : i32, i32
  }
  func.func @transform_4(%arg0: i32) -> (i32, i32) {
    %c0_i32 = arith.constant 0 : i32
    %c0_i32_0 = arith.constant 0 : i32
    %c0_i32_1 = arith.constant 0 : i32
    return %c0_i32, %c0_i32_0 : i32, i32
  }
  func.func @transform_5(%arg0: i32) -> (i32, i32) {
    %c0_i32 = arith.constant 0 : i32
    %c0_i32_0 = arith.constant 0 : i32
    return %c0_i32, %arg0 : i32, i32
  }
  func.func @transform_6(%arg0: i32) -> (i32, i32) {
    %c0_i32 = arith.constant 0 : i32
    %c0_i32_0 = arith.constant 0 : i32
    return %c0_i32, %arg0 : i32, i32
  }
}

</mosaic_0001>

<bundles_post_ra>
// kernel: squeeze.7
= control target key start
LH: loop header
LB: loop body
LE: loop exit
PB: predicated region body
PF: predicated region fallthrough
CT: control target
= control target key end

     0   :  { %vm17_vm0 = vcmask 64512   ;;  %s62_s0 = inlined_call_operand.vmem [shape: f32[8,3,3], index: 0, kind: input, shape index: {}]   ;;  %s63_s1 = inlined_call_operand.vmem [shape: f32[8,9], index: 1, kind: output, shape index: {}]  }
   0x1   :  { %v30_v0 = vld [vmem:[%s62_s0 + $0x8] sm:$0xf]  ;;  %v31_v1 = vld [vmem:[%s62_s0 + $0x4] sm:$0xf]  ;;  %v14_v2 = vld [vmem:[%s62_s0] sm:$0xf] }
   0x2   :  { %9 = vst [vmem:[#allocation0] sm:$0xf] %v30_v0  ;;  %13 = vst [vmem:[#allocation0 + $0x10] sm:$0xf] %v31_v1 }
   0x3   :  { %15 = vst [vmem:[#allocation0 + $0x8] sm:$0xf] %v14_v2 }
   0x9   :  { %v20_v4 = vld [vmem:[#allocation0 + $0x10] sm:$0x7]   ;;  %v25_v5 = vld [vmem:[#allocation0] sm:$0x7]  }
   0xa   :  { %v16_v3 = vld [vmem:[#allocation0 + $0x8] sm:$0x7]   ;;  %32 = vst.msk [vmem:[%s63_s1 + $0x3] sm:$0x7] %vm17_vm0, %v20_v4   ;;  %33 = vst.msk [vmem:[%s63_s1 + $0x6] sm:$0x7] %vm17_vm0, %v25_v5  }
   0xb   :  { %18 = vst.msk [vmem:[%s63_s1] sm:$0x7] %vm17_vm0, %v16_v3  }

// kernel: res_ghost_down_conv_pallas.1
= control target key start
LH: loop header
LB: loop body
LE: loop exit
PB: predicated region body
PF: predicated region fallthrough
CT: control target
= control target key end

     0   :  { %v3996_v3 = vmov 0.0   ;;  %vm41_vm0 = vcmask 64512   ;;  %v2217_v7 = vmov 9   ;;  %v2218_v8 = vmov 0   ;;  %s2228_s10 = smov 17   ;;  %s2229_s11 = smov 16   ;;  %s3985_s0 = inlined_call_operand.vmem [shape: f32[8,512], index: 0, kind: input, shape index: {}]   ;;  %s3986_s1 = inlined_call_operand.vmem [shape: f32[32,8], index: 1, kind: input, shape index: {}]   ;;  %s3987_s2 = inlined_call_operand.vmem [shape: f32[24,16], index: 2, kind: input, shape index: {}]   ;;  %s3988_s3 = inlined_call_operand.vmem [shape: f32[9,512], index: 3, kind: input, shape index: {}]   ;;  %s3989_s5 = inlined_call_operand.vmem [shape: f32[16,512], index: 5, kind: output, shape index: {0}]   ;;  %s3990_s4 = inlined_call_operand.vmem [shape: f32[512,128], index: 4, kind: input, shape index: {}]   ;;  %s3991_s6 = inlined_call_operand.vmem [shape: f32[16,128], index: 6, kind: output, shape index: {1}]  }
   0x1   :  { %v23_v0 = vld [vmem:[%s3985_s0 + $0x8] sm:$0xff]  ;;  %v25_v1 = vld [vmem:[%s3985_s0 + $0x18] sm:$0xff]  ;;  %v22_v2 = vld [vmem:[%s3985_s0] sm:$0xff]  ;;  %112 = vmatprep.mubr.f32.mxu0 %v3996_v3  ;;  %189 = vmatprep.mubr.f32.mxu1 %v3996_v3  ;;  %v2219_v9 = vmov 4   ;;  %v2220_v10 = vmov 1   ;;  %v2221_v11 = vmov 2   ;;  %v242_v56 = vlaneseq }
   0x2   :  { %78 = vmatprep.subr.mxu0 %v23_v0  ;;  %155 = vmatprep.subr.mxu1 %v25_v1  ;;  %v24_v4 = vld [vmem:[%s3985_s0 + $0x10] sm:$0xff]  ;;  %v29_v5 = vld [vmem:[%s3986_s1] sm:$0xff]  ;;  %v2222_v12 = vmov 3   ;;  %v2223_v13 = vmov 5   ;;  %v2224_v14 = vmov 6   ;;  %v3995_v15 = vmov 7  }
   0x3   :  { %79 = vmatpush1.msra.mxu0 %v22_v2  ;;  %156 = vmatpush1.msra.mxu1 %v24_v4  ;;  %v2293_v6 = vld [vmem:[%s3987_s2] sm:$0xff]  ;;  %v3994_v16 = vmov 8   ;;  %v30_v17 = vld [vmem:[%s3986_s1 + $0x8] sm:$0xff]  ;;  %v2227_v18 = vmov 10   ;;  %s2230_s12 = smov 15   ;;  %s2231_s13 = smov 1  }
   0x4   :  { %4096 = vst [vmem:[#allocation2_spill] sm:$0xff] %v2293_v6  ;;  %1970 = vmatmul.mubr.msk.f32.vlgmr.msra.gmra.mxu0 %vm41_vm0, %v29_v5  ;;  %1972 = vmatmul.mubr.msk.f32.vlgmr.msra.gmra.mxu1 %vm41_vm0, %v29_v5  ;;  %s2232_s14 = smov 127   ;;  %s2233_s15 = smov 113   ;;  %v2374_v32 = vld [vmem:[%s3987_s2 + $0x8] sm:$0xff]  ;;  %v2391_v33 = vld [vmem:[%s3987_s2 + $0x10] sm:$0xff]  ;;  %v3992_v34 = vmov 12  }
   0x5   :  { %2147 = vset.pattern.permute.xlu0 %v2217_v7  ;;  %2149 = vset.pattern.permute.xlu1 %v2218_v8  ;;  %s2234_s16 = smov 112   ;;  %s2235_s17 = smov 111   ;;  %4101 = vst [vmem:[#allocation7_spill] sm:$0xff] %v2374_v32  ;;  %4102 = vst [vmem:[#allocation8_spill] sm:$0xff] %v2391_v33  ;;  %v256_v58 = vshrl.u32 %v242_v56, 7  ;;  %v2474_v61 = vand.u32 127, %v242_v56 }
   0x6   :  { %33 = vperm.xlu0 %2147, %v2293_v6   ;;  %284 = vperm.xlu1 %2149, %v2293_v6   ;;  %v253_v4 = vld [vmem:[%s3988_s3] ss:$8 sm:$0xf] }
   0x7   :  { %118 = vmatprep.mubr.f32.mxu0 %v3996_v3  ;;  %195 = vmatprep.mubr.f32.mxu1 %v3996_v3  ;;  %v2476_v62 = vsub.s32 1, %v256_v58  ;;  %v2478_v63 = vsub.s32 2, %v256_v58  ;;  %v2480_v0 = vsub.s32 0, %v256_v58  ;;  %v2482_v1 = vsub.s32 3, %v256_v58 }
   0x8   :  { %1971 = vmatmul.mubr.msk.f32.gmra.mxu0 %vm41_vm0, %v30_v17  ;;  %1973 = vmatmul.mubr.msk.f32.gmra.mxu1 %vm41_vm0, %v30_v17  ;;  %vm244_vm1 = vcmp.lt.s32.totalorder %v2474_v61, 17  ;;  %vm323_vm2 = vcmp.lt.s32.totalorder %v2474_v61, 16  ;;  %vm403_vm3 = vcmp.lt.s32.totalorder %v2474_v61, 15  ;;  %vm483_vm4 = vcmp.lt.s32.totalorder %v2474_v61, 1 }
   0x9   :  { %960 = vmatprep.mubr.f32.mxu0 %v3996_v3  ;;  %1031 = vmatprep.mubr.f32.mxu1 %v3996_v3  ;;  %v2515_v17 = vrot.slane %v253_v4, %v2480_v0  ;;  %vm563_vm5 = vcmp.lt.s32.totalorder %v2474_v61, 127  ;;  %vm643_vm6 = vcmp.lt.s32.totalorder %v2474_v61, 113  ;;  %vm723_vm7 = vcmp.lt.s32.totalorder %v2474_v61, 112 }
   0xa   :  { %2148 = vset.pattern.permute.xlu0 %v2219_v9  ;;  %2158 = vset.pattern.permute.xlu1 %v2217_v7  ;;  %v1974_v7 = vld [vmem:[%s3988_s3 + $0x1] ss:$8 sm:$0xf]  ;;  %vm803_vm8 = vcmp.lt.s32.totalorder %v2474_v61, 111 }
   0xb   :  { %211 = vperm.xlu0 %2148, %v2293_v6   ;;  %4109 = vst [vmem:[#allocation15_spill] sm:$0xff] %v2515_v17 }
   0xf   :  { %2150 = vset.pattern.permute.xlu0 %v2220_v10 }
  0x10   :  { %364 = vperm.xlu0 %2150, %v2293_v6  }
  0x14   :  { %2151 = vset.pattern.permute.xlu0 %v2221_v11 }
  0x15   :  { %444 = vperm.xlu0 %2151, %v2293_v6  }
  0x19   :  { %2152 = vset.pattern.permute.xlu0 %v2222_v12 }
  0x1a   :  { %524 = vperm.xlu0 %2152, %v2293_v6  }
  0x1e   :  { %2153 = vset.pattern.permute.xlu0 %v2223_v13 }
  0x1f   :  { %604 = vperm.xlu0 %2153, %v2293_v6  }
  0x23   :  { %2154 = vset.pattern.permute.xlu0 %v2224_v14 }
  0x24   :  { %684 = vperm.xlu0 %2154, %v2293_v6  }
  0x28   :  { %2155 = vset.pattern.permute.xlu0 %v3995_v15 }
  0x29   :  { %764 = vperm.xlu0 %2155, %v2293_v6  }
  0x2d   :  { %2156 = vset.pattern.permute.xlu0 %v3994_v16 }
  0x2e   :  { %844 = vperm.xlu0 %2156, %v2293_v6  }
  0x32   :  { %2157 = vset.pattern.permute.xlu0 %v2227_v18 }
  0x81   :  { %v34_v19 = vpop.permute.xlu0 %33  ;;  %v2428_v35 = vpop.permute.xlu1 %284 }
  0x86   :  { %v212_v36 = vpop.permute.xlu0 %211 }
  0x8b   :  { %v2435_v38 = vpop.permute.xlu0 %364 }
  0x90   :  { %v2441_v40 = vpop.permute.xlu0 %444 }
  0x95   :  { %v2448_v43 = vpop.permute.xlu0 %524 }
  0x9a   :  { %v2452_v45 = vpop.permute.xlu0 %604 }
  0x9f   :  { %v2458_v48 = vpop.permute.xlu0 %684 }
  0xa0   :  { %4103 = vst [vmem:[#allocation9_spill] sm:$0xff] %v2458_v48 }
  0xa4   :  { %v2462_v50 = vpop.permute.xlu0 %764 }
  0xa5   :  { %4105 = vst [vmem:[#allocation11_spill] sm:$0xff] %v2462_v50 }
  0xa9   :  { %v2464_v53 = vpop.permute.xlu0 %844 }
  0xaa   :  { %4106 = vst [vmem:[#allocation12_spill] sm:$0xff] %v2464_v53 }
  0xc4   :  { %v114_v20 = vpop.f32.mrf.mxu0  ;;  %v191_v21 = vpop.f32.mrf.mxu1 }
  0xc5   :  { %v115_v22 = vadd.f32 %v114_v20, %v34_v19  ;;  %v192_v23 = vadd.f32 %v191_v21, %v34_v19  ;;  %v2524_v20 = vrot.slane %v1974_v7, %v2476_v62  ;;  %v2527_v21 = vrot.slane %v1974_v7, %v2478_v63 }
  0xc6   :  { %v116_v26 = vpop.f32.mrf.mxu0  ;;  %v193_v28 = vpop.f32.mrf.mxu1 }
  0xc7   :  { %v2326_v24 = vmax.f32 %v115_v22, 0.0  ;;  %v2328_v25 = vmax.f32 %v192_v23, 0.0  ;;  %v117_v27 = vadd.f32 %v116_v26, %v34_v19  ;;  %v194_v30 = vadd.f32 %v193_v28, %v34_v19  ;;  %4111 = vst [vmem:[#allocation17_spill] sm:$0xff] %v2524_v20  ;;  %4112 = vst [vmem:[#allocation18_spill] sm:$0xff] %v2527_v21 }
  0xc8   :  { %v2530_v22 = vrot.slane %v1974_v7, %v2480_v0  ;;  %v1976_v23 = vld [vmem:[%s3988_s3 + $0x3] ss:$8 sm:$0xf]  ;;  %v2536_v26 = vrot.slane %v1974_v7, %v2482_v1 }
  0xc9   :  { %4097 = vst [vmem:[#allocation3_spill] sm:$0xff] %v2326_v24  ;;  %4098 = vst [vmem:[#allocation4_spill] sm:$0xff] %v2328_v25  ;;  %234 = vrot.lane.b32.xlu0 %v2328_v25, %s2228_s10  ;;  %226 = vrot.lane.b32.xlu1 %v2326_v24, %s2228_s10  ;;  %v2362_v29 = vmax.f32 %v117_v27, 0.0  ;;  %v2367_v31 = vmax.f32 %v194_v30, 0.0  ;;  %v2490_v5 = vmul.f32 %v212_v36, %v2326_v24 }
  0xca   :  { %4113 = vst [vmem:[#allocation19_spill] sm:$0xff] %v2536_v26  ;;  %v1977_v30 = vld [vmem:[%s3988_s3 + $0x5] ss:$8 sm:$0xf]  ;;  %v2560_v7 = vrot.slane %v1976_v23, %v2476_v62  ;;  %v2566_v16 = vrot.slane %v1976_v23, %v2480_v0  ;;  %v2569_v15 = vrot.slane %v1976_v23, %v2482_v1 }
  0xcb   :  { %4099 = vst [vmem:[#allocation5_spill] sm:$0xff] %v2362_v29  ;;  %4100 = vst [vmem:[#allocation6_spill] sm:$0xff] %v2367_v31 }
  0xcd   :  { %315 = vrot.lane.b32.xlu0 %v2328_v25, %s2229_s11  ;;  %307 = vrot.lane.b32.xlu1 %v2326_v24, %s2229_s11 }
  0xd1   :  { %395 = vrot.lane.b32.xlu0 %v2328_v25, %s2230_s12  ;;  %387 = vrot.lane.b32.xlu1 %v2326_v24, %s2230_s12 }
  0xd5   :  { %475 = vrot.lane.b32.xlu0 %v2328_v25, %s2231_s13  ;;  %467 = vrot.lane.b32.xlu1 %v2326_v24, %s2231_s13 }
  0xd9   :  { %555 = vrot.lane.b32.xlu0 %v2328_v25, %s2232_s14  ;;  %547 = vrot.lane.b32.xlu1 %v2326_v24, %s2232_s14 }
  0xdd   :  { %635 = vrot.lane.b32.xlu0 %v2328_v25, %s2233_s15  ;;  %627 = vrot.lane.b32.xlu1 %v2326_v24, %s2233_s15 }
  0xe1   :  { %715 = vrot.lane.b32.xlu0 %v2328_v25, %s2234_s16  ;;  %707 = vrot.lane.b32.xlu1 %v2326_v24, %s2234_s16 }
  0xe5   :  { %795 = vrot.lane.b32.xlu0 %v2328_v25, %s2235_s17  ;;  %787 = vrot.lane.b32.xlu1 %v2326_v24, %s2235_s17 }
  0xe9   :  { %230 = vrot.lane.b32.xlu1 %v2362_v29, %s2228_s10  ;;  %868 = vperm.xlu0 %2157, %v2293_v6  }
  0xed   :  { %238 = vrot.lane.b32.xlu1 %v2367_v31, %s2228_s10  ;;  %2161 = vset.pattern.permute.xlu0 %v2218_v8 }
  0xee   :  { %288 = vperm.xlu0 %2161, %v2374_v32  }
  0xf1   :  { %311 = vrot.lane.b32.xlu1 %v2362_v29, %s2229_s11 }
  0xf2   :  { %2162 = vset.pattern.permute.xlu0 %v2220_v10  ;;  %v2502_v10 = vmul.f32 %v212_v36, %v2367_v31 }
  0xf3   :  { %368 = vperm.xlu0 %2162, %v2374_v32  }
  0xf5   :  { %319 = vrot.lane.b32.xlu1 %v2367_v31, %s2229_s11 }
  0xf7   :  { %1249 = vperm.xlu0 %2162, %v2391_v33  }
  0xf9   :  { %391 = vrot.lane.b32.xlu1 %v2362_v29, %s2230_s12 }
  0xfb   :  { %2164 = vset.pattern.permute.xlu0 %v2221_v11  ;;  %v1975_v11 = vld [vmem:[%s3988_s3 + $0x2] ss:$8 sm:$0xf] }
  0xfc   :  { %448 = vperm.xlu0 %2164, %v2374_v32   ;;  %v2540_v27 = vrot.slane %v1975_v11, %v2476_v62  ;;  %v2543_v28 = vrot.slane %v1975_v11, %v2478_v63  ;;  %v2554_v58 = vrot.slane %v1975_v11, %v2480_v0 }
  0xfd   :  { %399 = vrot.lane.b32.xlu1 %v2367_v31, %s2230_s12 }
 0x100   :  { %1277 = vperm.xlu0 %2164, %v2391_v33  }
 0x101   :  { %471 = vrot.lane.b32.xlu1 %v2362_v29, %s2231_s13 }
 0x104   :  { %2165 = vset.pattern.permute.xlu0 %v2222_v12 }
 0x105   :  { %479 = vrot.lane.b32.xlu1 %v2367_v31, %s2231_s13  ;;  %528 = vperm.xlu0 %2165, %v2374_v32  }
 0x109   :  { %551 = vrot.lane.b32.xlu1 %v2362_v29, %s2232_s14  ;;  %1305 = vperm.xlu0 %2165, %v2391_v33  }
 0x10d   :  { %559 = vrot.lane.b32.xlu1 %v2367_v31, %s2232_s14  ;;  %2166 = vset.pattern.permute.xlu0 %v2223_v13  ;;  %v2509_v13 = vrot.slane %v253_v4, %v2476_v62 }
 0x10e   :  { %608 = vperm.xlu0 %2166, %v2374_v32  }
 0x10f   :  { %4107 = vst [vmem:[#allocation13_spill] sm:$0xff] %v2509_v13 }
 0x111   :  { %631 = vrot.lane.b32.xlu1 %v2362_v29, %s2233_s15 }
 0x112   :  { %1333 = vperm.xlu0 %2166, %v2391_v33  }
 0x115   :  { %639 = vrot.lane.b32.xlu1 %v2367_v31, %s2233_s15 }
 0x116   :  { %2167 = vset.pattern.permute.xlu0 %v2224_v14  ;;  %v2512_v14 = vrot.slane %v253_v4, %v2478_v63 }
 0x118   :  { %4108 = vst [vmem:[#allocation14_spill] sm:$0xff] %v2512_v14 }
 0x119   :  { %711 = vrot.lane.b32.xlu1 %v2362_v29, %s2234_s16 }
 0x11d   :  { %719 = vrot.lane.b32.xlu1 %v2367_v31, %s2234_s16 }
 0x121   :  { %791 = vrot.lane.b32.xlu1 %v2362_v29, %s2235_s17 }
 0x125   :  { %799 = vrot.lane.b32.xlu1 %v2367_v31, %s2235_s17 }
 0x129   :  { %38 = vperm.xlu1 %2158, %v2374_v32  }
 0x12d   :  { %1185 = vperm.xlu1 %2158, %v2391_v33  }
 0x131   :  { %2159 = vset.pattern.permute.xlu1 %v3992_v34  ;;  %v2563_v34 = vrot.slane %v1976_v23, %v2478_v63  ;;  %v2587_v23 = vrot.slane %v1977_v30, %v2482_v1 }
 0x132   :  { %1453 = vperm.xlu1 %2159, %v2293_v6   ;;  %v2581_v6 = vrot.slane %v1977_v30, %v2476_v62 }
 0x136   :  { %2160 = vset.pattern.permute.xlu1 %v2219_v9  ;;  %v2499_v9 = vmul.f32 %v212_v36, %v2328_v25 }
 0x137   :  { %215 = vperm.xlu1 %2160, %v2374_v32   ;;  %v1979_v32 = vld [vmem:[%s3988_s3 + $0x7] ss:$8 sm:$0xf] }
 0x13b   :  { %v2432_v37 = vpop.permute.xlu1 %226  ;;  %1197 = vperm.xlu1 %2160, %v2391_v33   ;;  %v235_v55 = vpop.permute.xlu0 %234 }
 0x13f   :  { %v2437_v39 = vpop.permute.xlu1 %307  ;;  %2163 = vset.pattern.permute.xlu1 %v2218_v8  ;;  %v2472_v60 = vpop.permute.xlu0 %315  ;;  %v2496_v8 = vmul.f32 %v212_v36, %v2362_v29 }
 0x140   :  { %1221 = vperm.xlu1 %2163, %v2391_v33   ;;  %v2584_v33 = vrot.slane %v1977_v30, %v2478_v63 }
 0x143   :  { %v2443_v41 = vpop.permute.xlu1 %387  ;;  %v396_v12 = vpop.permute.xlu0 %395 }
 0x144   :  { %2171 = vset.pattern.permute.xlu1 %v2227_v18  ;;  %v2518_v18 = vrot.slane %v253_v4, %v2482_v1  ;;  %v2557_v4 = vrot.slane %v1975_v11, %v2482_v1  ;;  %v2578_v11 = vrot.slane %v1977_v30, %v2480_v0 }
 0x146   :  { %4110 = vst [vmem:[#allocation16_spill] sm:$0xff] %v2518_v18 }
 0x147   :  { %v2446_v42 = vpop.permute.xlu1 %467  ;;  %v476_v25 = vpop.permute.xlu0 %475 }
 0x14b   :  { %v2450_v44 = vpop.permute.xlu1 %547 }
 0x14f   :  { %v2454_v46 = vpop.permute.xlu1 %627 }
 0x153   :  { %v2456_v47 = vpop.permute.xlu1 %707 }
 0x157   :  { %v2460_v49 = vpop.permute.xlu1 %787 }
 0x158   :  { %4104 = vst [vmem:[#allocation10_spill] sm:$0xff] %v2460_v49 }
 0x15b   :  { %v231_v51 = vpop.permute.xlu1 %230 }
 0x15c   :  { %v247_v36 = vsel %vm244_vm1, %v231_v51, %v235_v55  ;;  %v249_v56 = vsel %vm244_vm1, %v2432_v37, %v231_v51  ;;  %v1978_v51 = vld [vmem:[%s3988_s3 + $0x6] ss:$8 sm:$0xf] }
 0x15d   :  { %v276_v31 = vmul.f32 %v2509_v13, %v249_v56  ;;  %v277_v24 = vmul.f32 %v2512_v14, %v247_v36  ;;  %v2600_v49 = vrot.slane %v1978_v51, %v2480_v0  ;;  %v2603_v30 = vrot.slane %v1978_v51, %v2476_v62 }
 0x15e   :  { %v2606_v50 = vrot.slane %v1978_v51, %v2478_v63  ;;  %v2609_v56 = vrot.slane %v1978_v51, %v2482_v1  ;;  %v2622_v36 = vrot.slane %v1979_v32, %v2480_v0  ;;  %v2625_v14 = vrot.slane %v1979_v32, %v2476_v62 }
 0x15f   :  { %v239_v52 = vpop.permute.xlu1 %238 }
 0x160   :  { %v245_v29 = vsel %vm244_vm1, %v235_v55, %v239_v52  ;;  %v251_v53 = vsel %vm244_vm1, %v239_v52, %v2432_v37  ;;  %4114 = vst [vmem:[#allocation20_spill] sm:$0xff] %v2606_v50  ;;  %4115 = vst [vmem:[#allocation21_spill] sm:$0xff] %v2609_v56  ;;  %v292_v56 = vmul.f32 %v2428_v35, %v276_v31 }
 0x161   :  { %v275_v51 = vmul.f32 %v2515_v17, %v251_v53  ;;  %v278_v13 = vmul.f32 %v2518_v18, %v245_v29  ;;  %v293_v50 = vmul.f32 %v2428_v35, %v277_v24 }
 0x163   :  { %v2466_v54 = vpop.permute.xlu1 %311 }
 0x164   :  { %v326_v55 = vsel %vm323_vm2, %v2466_v54, %v2472_v60  ;;  %v328_v37 = vsel %vm323_vm2, %v2437_v39, %v2466_v54 }
 0x165   :  { %v357_v18 = vmul.f32 %v2527_v21, %v326_v55  ;;  %v2663_v55 = vrot.slane %v1979_v32, %v2478_v63 }
 0x167   :  { %v2468_v57 = vpop.permute.xlu1 %319  ;;  %4116 = vst [vmem:[#allocation22_spill] sm:$0xff] %v2663_v55 }
 0x168   :  { %v324_v48 = vsel %vm323_vm2, %v2472_v60, %v2468_v57  ;;  %v330_v54 = vsel %vm323_vm2, %v2468_v57, %v2437_v39  ;;  %v356_v60 = vmul.f32 %v2524_v20, %v328_v37  ;;  %v1980_v39 = vld [vmem:[%s3988_s3 + $0x20] ss:$8 sm:$0xf]  ;;  %v556_v57 = vpop.permute.xlu0 %555 }
 0x169   :  { %v358_v37 = vmul.f32 %v2536_v26, %v324_v48  ;;  %v2676_v26 = vrot.slane %v1980_v39, %v2480_v0 }
 0x16b   :  { %v2470_v59 = vpop.permute.xlu1 %391  ;;  %4118 = vst [vmem:[#allocation24_spill] sm:$0xff] %v2676_v26 }
 0x16c   :  { %v406_v53 = vsel %vm403_vm3, %v2470_v59, %v396_v12  ;;  %v408_v29 = vsel %vm403_vm3, %v2443_v41, %v2470_v59  ;;  %v355_v59 = vmul.f32 %v2530_v22, %v330_v54 }
 0x16d   :  { %v436_v21 = vmul.f32 %v2540_v27, %v408_v29  ;;  %v437_v17 = vmul.f32 %v2543_v28, %v406_v53  ;;  %v373_v53 = vmul.f32 %v2435_v38, %v357_v18 }
 0x16e   :  { %v371_v29 = vmul.f32 %v2435_v38, %v355_v59 }
 0x16f   :  { %v2484_v2 = vpop.permute.xlu1 %399  ;;  %v452_v18 = vmul.f32 %v2441_v40, %v436_v21  ;;  %v2713_v21 = vrot.slane %v1980_v39, %v2482_v1 }
 0x170   :  { %v404_v31 = vsel %vm403_vm3, %v396_v12, %v2484_v2  ;;  %v410_v24 = vsel %vm403_vm3, %v2484_v2, %v2443_v41  ;;  %v2666_v12 = vrot.slane %v1979_v32, %v2482_v1  ;;  %v291_v41 = vmul.f32 %v2428_v35, %v275_v51 }
 0x171   :  { %v294_v2 = vmul.f32 %v2428_v35, %v278_v13  ;;  %v435_v54 = vmul.f32 %v2554_v58, %v410_v24  ;;  %v438_v48 = vmul.f32 %v2557_v4, %v404_v31  ;;  %v2679_v32 = vrot.slane %v1980_v39, %v2476_v62  ;;  %4121 = vst [vmem:[#allocation27_spill] sm:$0xff] %v2713_v21 }
 0x172   :  { %4117 = vst [vmem:[#allocation23_spill] sm:$0xff] %v2666_v12  ;;  %v300_v51 = vadd.f32 %v292_v56, %v2496_v8  ;;  %v301_v35 = vadd.f32 %v293_v50, %v2499_v9  ;;  %v372_v13 = vmul.f32 %v2435_v38, %v356_v60  ;;  %v374_v31 = vmul.f32 %v2435_v38, %v358_v37  ;;  %v636_v60 = vpop.permute.xlu0 %635 }
 0x173   :  { %v2520_v19 = vpop.permute.xlu1 %471  ;;  %4119 = vst [vmem:[#allocation25_spill] sm:$0xff] %v2679_v32  ;;  %v299_v50 = vadd.f32 %v291_v41, %v2490_v5  ;;  %v302_v9 = vadd.f32 %v294_v2, %v2502_v10  ;;  %v453_v56 = vmul.f32 %v2441_v40, %v437_v17  ;;  %v451_v38 = vmul.f32 %v2441_v40, %v435_v54 }
 0x174   :  { %v486_v0 = vsel %vm483_vm4, %v2520_v19, %v476_v25  ;;  %v488_v62 = vsel %vm483_vm4, %v2446_v42, %v2520_v19  ;;  %v454_v24 = vmul.f32 %v2441_v40, %v438_v48  ;;  %v2710_v17 = vrot.slane %v1980_v39, %v2478_v63 }
 0x175   :  { %v516_v10 = vmul.f32 %v2560_v7, %v488_v62  ;;  %v517_v19 = vmul.f32 %v2563_v34, %v486_v0  ;;  %v380_v40 = vadd.f32 %v372_v13, %v300_v51  ;;  %v381_v37 = vadd.f32 %v373_v53, %v301_v35 }
 0x176   :  { %4120 = vst [vmem:[#allocation26_spill] sm:$0xff] %v2710_v17  ;;  %v379_v41 = vadd.f32 %v371_v29, %v299_v50  ;;  %v382_v2 = vadd.f32 %v374_v31, %v302_v9  ;;  %v716_v31 = vpop.permute.xlu0 %715 }
 0x177   :  { %v2571_v3 = vpop.permute.xlu1 %479  ;;  %v460_v63 = vadd.f32 %v452_v18, %v380_v40  ;;  %v461_v1 = vadd.f32 %v453_v56, %v381_v37  ;;  %v532_v35 = vmul.f32 %v2448_v43, %v516_v10  ;;  %v533_v13 = vmul.f32 %v2448_v43, %v517_v19 }
 0x178   :  { %v484_v59 = vsel %vm483_vm4, %v476_v25, %v2571_v3  ;;  %v490_v5 = vsel %vm483_vm4, %v2571_v3, %v2446_v42  ;;  %v459_v39 = vadd.f32 %v451_v38, %v379_v41  ;;  %v462_v51 = vadd.f32 %v454_v24, %v382_v2 }
 0x179   :  { %v515_v54 = vmul.f32 %v2566_v16, %v490_v5  ;;  %v518_v48 = vmul.f32 %v2569_v15, %v484_v59 }
 0x17b   :  { %v2619_v52 = vpop.permute.xlu1 %551  ;;  %v531_v18 = vmul.f32 %v2448_v43, %v515_v54  ;;  %v534_v56 = vmul.f32 %v2448_v43, %v518_v48  ;;  %v541_v43 = vadd.f32 %v533_v13, %v461_v1  ;;  %v4123_v48 = vld [vmem:[#allocation21_spill] sm:$0xff] }
 0x17c   :  { %v566_v3 = vsel %vm563_vm5, %v2619_v52, %v556_v57  ;;  %v568_v42 = vsel %vm563_vm5, %v2450_v44, %v2619_v52  ;;  %v4124_v1 = vld [vmem:[#allocation9_spill] sm:$0xff] }
 0x17d   :  { %v595_v52 = vmul.f32 %v2578_v11, %v568_v42  ;;  %v596_v0 = vmul.f32 %v2581_v6, %v566_v3  ;;  %v539_v42 = vadd.f32 %v531_v18, %v459_v39 }
 0x17f   :  { %v560_v20 = vpop.permute.xlu1 %559  ;;  %v611_v19 = vmul.f32 %v2452_v45, %v595_v52  ;;  %v612_v40 = vmul.f32 %v2452_v45, %v596_v0 }
 0x180   :  { %v564_v62 = vsel %vm563_vm5, %v556_v57, %v560_v20  ;;  %v570_v50 = vsel %vm563_vm5, %v560_v20, %v2450_v44  ;;  %v540_v20 = vadd.f32 %v532_v35, %v460_v63  ;;  %v542_v63 = vadd.f32 %v534_v56, %v462_v51 }
 0x181   :  { %v597_v5 = vmul.f32 %v2584_v33, %v564_v62  ;;  %v598_v10 = vmul.f32 %v2587_v23, %v570_v50  ;;  %v796_v62 = vpop.permute.xlu0 %795 }
 0x182   :  { %v620_v50 = vadd.f32 %v612_v40, %v540_v20 }
 0x183   :  { %v632_v8 = vpop.permute.xlu1 %631 }
 0x184   :  { %v646_v53 = vsel %vm643_vm6, %v632_v8, %v636_v60  ;;  %v648_v29 = vsel %vm643_vm6, %v2454_v46, %v632_v8 }
 0x185   :  { %v675_v24 = vmul.f32 %v2600_v49, %v648_v29  ;;  %v676_v57 = vmul.f32 %v2603_v30, %v646_v53  ;;  %v613_v53 = vmul.f32 %v2452_v45, %v597_v5  ;;  %v614_v29 = vmul.f32 %v2452_v45, %v598_v10  ;;  %v4126_v45 = vld [vmem:[#allocation10_spill] sm:$0xff] }
 0x187   :  { %v640_v25 = vpop.permute.xlu1 %639  ;;  %v691_v35 = vmul.f32 %v4124_v1, %v675_v24  ;;  %v692_v13 = vmul.f32 %v4124_v1, %v676_v57  ;;  %v621_v20 = vadd.f32 %v613_v53, %v541_v43  ;;  %v622_v5 = vadd.f32 %v614_v29, %v542_v63  ;;  %v869_v63 = vpop.permute.xlu0 %868 }
 0x188   :  { %v644_v59 = vsel %vm643_vm6, %v636_v60, %v640_v25  ;;  %v650_v44 = vsel %vm643_vm6, %v640_v25, %v2454_v46  ;;  %v4122_v60 = vld [vmem:[#allocation20_spill] sm:$0xff] }
 0x189   :  { %v677_v54 = vmul.f32 %v4122_v60, %v644_v59  ;;  %v678_v3 = vmul.f32 %v4123_v48, %v650_v44  ;;  %v700_v57 = vadd.f32 %v692_v13, %v620_v50 }
 0x18b   :  { %v712_v9 = vpop.permute.xlu1 %711  ;;  %v693_v51 = vmul.f32 %v4124_v1, %v677_v54  ;;  %v694_v18 = vmul.f32 %v4124_v1, %v678_v3 }
 0x18c   :  { %v726_v8 = vsel %vm723_vm7, %v712_v9, %v716_v31  ;;  %v728_v38 = vsel %vm723_vm7, %v2456_v47, %v712_v9  ;;  %v4125_v9 = vld [vmem:[#allocation11_spill] sm:$0xff] }
 0x18d   :  { %v755_v37 = vmul.f32 %v2622_v36, %v728_v38  ;;  %v756_v41 = vmul.f32 %v2625_v14, %v726_v8 }
 0x18f   :  { %v720_v2 = vpop.permute.xlu1 %719  ;;  %v771_v8 = vmul.f32 %v4125_v9, %v755_v37  ;;  %v4127_v37 = vld [vmem:[#allocation12_spill] sm:$0xff] }
 0x190   :  { %v724_v46 = vsel %vm723_vm7, %v716_v31, %v720_v2  ;;  %v730_v25 = vsel %vm723_vm7, %v720_v2, %v2456_v47  ;;  %v619_v31 = vadd.f32 %v611_v19, %v539_v42  ;;  %v772_v47 = vmul.f32 %v4125_v9, %v756_v41 }
 0x191   :  { %v757_v52 = vmul.f32 %v2663_v55, %v724_v46  ;;  %v758_v0 = vmul.f32 %v2666_v12, %v730_v25  ;;  %v701_v46 = vadd.f32 %v693_v51, %v621_v20  ;;  %v702_v25 = vadd.f32 %v694_v18, %v622_v5  ;;  %v892_v51 = vld [vmem:[%s3986_s1 + $0x18] sm:$0xff]  ;;  %v891_v5 = vld [vmem:[%s3986_s1 + $0x10] sm:$0xff] }
 0x192   :  { %v699_v24 = vadd.f32 %v691_v35, %v619_v31  ;;  %v780_v3 = vadd.f32 %v772_v47, %v700_v57  ;;  %v4129_v57 = vld [vmem:[#allocation3_spill] sm:$0xff]  ;;  %v4130_v20 = vmov 0.0  }
 0x193   :  { %v792_v39 = vpop.permute.xlu1 %791  ;;  %v773_v10 = vmul.f32 %v4125_v9, %v757_v52  ;;  %v774_v19 = vmul.f32 %v4125_v9, %v758_v0 }
 0x194   :  { %v806_v56 = vsel %vm803_vm8, %v792_v39, %v796_v62  ;;  %v808_v38 = vsel %vm803_vm8, %v4126_v45, %v792_v39  ;;  %v779_v40 = vadd.f32 %v771_v8, %v699_v24 }
 0x195   :  { %v835_v59 = vmul.f32 %v2676_v26, %v808_v38  ;;  %v836_v44 = vmul.f32 %v2679_v32, %v806_v56  ;;  %v781_v29 = vadd.f32 %v773_v10, %v701_v46  ;;  %v782_v52 = vadd.f32 %v774_v19, %v702_v25  ;;  %v4128_v38 = vld [vmem:[#allocation5_spill] sm:$0xff] }
 0x197   :  { %v851_v41 = vmul.f32 %v4127_v37, %v835_v59  ;;  %v852_v2 = vmul.f32 %v4127_v37, %v836_v44  ;;  %v800_v54 = vpop.permute.xlu1 %799  ;;  %v120_v59 = vpop.f32.mrf.mxu0 }
 0x198   :  { %v804_v42 = vsel %vm803_vm8, %v796_v62, %v800_v54  ;;  %v810_v43 = vsel %vm803_vm8, %v800_v54, %v4126_v45  ;;  %v197_v44 = vpop.f32.mrf.mxu1  ;;  %v4133_v54 = vld [vmem:[#allocation4_spill] sm:$0xff] }
 0x199   :  { %v837_v1 = vmul.f32 %v2710_v17, %v804_v42  ;;  %v838_v35 = vmul.f32 %v2713_v21, %v810_v43  ;;  %v859_v13 = vadd.f32 %v851_v41, %v779_v40  ;;  %v860_v53 = vadd.f32 %v852_v2, %v780_v3  ;;  %v122_v3 = vpop.f32.mrf.mxu0  ;;  %v4134_v42 = vld [vmem:[#allocation7_spill] sm:$0xff] }
 0x19a   :  { %v199_v25 = vpop.f32.mrf.mxu1  ;;  %v4149_v21 = vld [vmem:[#allocation15_spill] sm:$0xff] }
 0x19b   :  { %v853_v0 = vmul.f32 %v4127_v37, %v837_v1  ;;  %v854_v31 = vmul.f32 %v4127_v37, %v838_v35  ;;  %v875_v50 = vadd.f32 %v869_v63, %v859_v13  ;;  %v876_v9 = vadd.f32 %v869_v63, %v860_v53  ;;  %v4131_v37 = vld [vmem:[#allocation6_spill] sm:$0xff]  ;;  %v4135_v35 = vld [vmem:[#allocation8_spill] sm:$0xff] }
 0x19c   :  { %v4136_v13 = vmov 7   ;;  %v4137_v53 = vmov 8  }
 0x19d   :  { %v861_v62 = vadd.f32 %v853_v0, %v781_v29  ;;  %v883_v8 = vmax.f32 %v875_v50, 0.0  ;;  %v884_v47 = vmax.f32 %v876_v9, 0.0  ;;  %v862_v39 = vadd.f32 %v854_v31, %v782_v52  ;;  %v2876_v29 = vpop.permute.xlu0 %288  ;;  %v4138_v0 = vld [vmem:[#allocation2_spill] sm:$0xff] }
 0x19e   :  { %v2237_v52 = vmov 11  }
 0x19f   :  { %v877_v18 = vadd.f32 %v869_v63, %v861_v62  ;;  %926 = vmatprep.subr.mxu0 %v884_v47  ;;  %v878_v56 = vadd.f32 %v869_v63, %v862_v39 }
 0x1a0   :  { %927 = vmatpush1.msra.mxu0 %v883_v8 }
 0x1a1   :  { %v885_v45 = vmax.f32 %v877_v18, 0.0  ;;  %1981 = vmatmul.mubr.msk.f32.vlgmr.msra.gmra.mxu0 %vm41_vm0, %v892_v51  ;;  %1071 = vmatprep.subr.mxu0 %v4128_v38  ;;  %v886_v24 = vmax.f32 %v878_v56, 0.0  ;;  %v2883_v31 = vpop.permute.xlu0 %368 }
 0x1a2   :  { %1072 = vmatpush1.msra.mxu0 %v4129_v57  ;;  %1105 = vmatprep.mubr.f32.mxu0 %v4130_v20 }
 0x1a3   :  { %997 = vmatprep.subr.mxu1 %v886_v24 }
 0x1a4   :  { %998 = vmatpush1.msra.mxu1 %v885_v45  ;;  %v39_v10 = vpop.permute.xlu1 %38 }
 0x1a5   :  { %v121_v19 = vadd.f32 %v120_v59, %v39_v10  ;;  %v198_v40 = vadd.f32 %v197_v44, %v39_v10  ;;  %1982 = vmatmul.mubr.msk.f32.vlgmr.msra.gmra.mxu1 %vm41_vm0, %v892_v51  ;;  %1983 = vmatmul.mubr.msk.f32.vlgmr.msra.gmra.mxu0 %vm41_vm0, %v891_v5  ;;  %v123_v46 = vadd.f32 %v122_v3, %v39_v10  ;;  %v2887_v50 = vpop.permute.xlu0 %1249 }
 0x1a6   :  { %1142 = vmatprep.subr.mxu1 %v4131_v37  ;;  %1176 = vmatprep.mubr.f32.mxu1 %v4130_v20  ;;  %v200_v63 = vadd.f32 %v199_v25, %v39_v10  ;;  %4139 = vst [vmem:[#allocation21_spill] sm:$0xff] %v2887_v50 }
 0x1a7   :  { %v2810_v41 = vmax.f32 %v121_v19, 0.0  ;;  %v2812_v2 = vmax.f32 %v198_v40, 0.0  ;;  %1143 = vmatpush1.msra.mxu1 %v4133_v54  ;;  %v2841_v43 = vmax.f32 %v123_v46, 0.0 }
 0x1a8   :  { %v2847_v1 = vmax.f32 %v200_v63, 0.0  ;;  %v2901_v8 = vpop.permute.xlu1 %1185 }
 0x1a9   :  { %4132 = vst [vmem:[#allocation20_spill] sm:$0xff] %v2812_v2  ;;  %1984 = vmatmul.mubr.msk.f32.vlgmr.msra.gmra.mxu1 %vm41_vm0, %v891_v5  ;;  %236 = vrot.lane.b32.xlu0 %v2812_v2, %s2228_s10  ;;  %v2893_v9 = vpop.permute.xlu0 %448 }
 0x1aa   :  { %228 = vrot.lane.b32.xlu1 %v2810_v41, %s2228_s10 }
 0x1ad   :  { %309 = vrot.lane.b32.xlu0 %v2810_v41, %s2229_s11  ;;  %v2897_v62 = vpop.permute.xlu0 %1277  ;;  %v2908_v39 = vpop.permute.xlu1 %1453 }
 0x1ae   :  { %389 = vrot.lane.b32.xlu1 %v2810_v41, %s2230_s12  ;;  %4140 = vst [vmem:[#allocation9_spill] sm:$0xff] %v2897_v62  ;;  %4141 = vst [vmem:[#allocation11_spill] sm:$0xff] %v2908_v39 }
 0x1b1   :  { %317 = vrot.lane.b32.xlu0 %v2812_v2, %s2229_s11  ;;  %v2905_v47 = vpop.permute.xlu0 %528 }
 0x1b2   :  { %469 = vrot.lane.b32.xlu1 %v2810_v41, %s2231_s13  ;;  %v216_v18 = vpop.permute.xlu1 %215 }
 0x1b3   :  { %v222_v55 = vmul.f32 %v216_v18, %v2810_v41 }
 0x1b5   :  { %397 = vrot.lane.b32.xlu0 %v2812_v2, %s2230_s12  ;;  %v2910_v51 = vpop.permute.xlu0 %1305 }
 0x1b6   :  { %549 = vrot.lane.b32.xlu1 %v2810_v41, %s2232_s14  ;;  %4142 = vst [vmem:[#allocation10_spill] sm:$0xff] %v2910_v51  ;;  %v2914_v45 = vpop.permute.xlu1 %1197 }
 0x1b7   :  { %4143 = vst [vmem:[#allocation12_spill] sm:$0xff] %v2914_v45 }
 0x1b9   :  { %477 = vrot.lane.b32.xlu0 %v2812_v2, %s2231_s13  ;;  %v2912_v56 = vpop.permute.xlu0 %608 }
 0x1ba   :  { %629 = vrot.lane.b32.xlu1 %v2810_v41, %s2233_s15 }
 0x1bb   :  { %v2918_v24 = vpop.permute.xlu1 %1221 }
 0x1bc   :  { %4145 = vst [vmem:[#allocation3_spill] sm:$0xff] %v2918_v24 }
 0x1bd   :  { %557 = vrot.lane.b32.xlu0 %v2812_v2, %s2232_s14  ;;  %v2916_v38 = vpop.permute.xlu0 %1333 }
 0x1be   :  { %709 = vrot.lane.b32.xlu1 %v2810_v41, %s2234_s16  ;;  %4144 = vst [vmem:[#allocation5_spill] sm:$0xff] %v2916_v38 }
 0x1c1   :  { %688 = vperm.xlu0 %2167, %v4134_v42  }
 0x1c2   :  { %789 = vrot.lane.b32.xlu1 %v2810_v41, %s2235_s17 }
 0x1c5   :  { %637 = vrot.lane.b32.xlu0 %v2812_v2, %s2233_s15 }
 0x1c6   :  { %232 = vrot.lane.b32.xlu1 %v2841_v43, %s2228_s10 }
 0x1c9   :  { %1361 = vperm.xlu0 %2167, %v4135_v35  }
 0x1ca   :  { %240 = vrot.lane.b32.xlu1 %v2847_v1, %s2228_s10 }
 0x1cd   :  { %2168 = vset.pattern.permute.xlu0 %v4136_v13  ;;  %v4147_v13 = vld [vmem:[#allocation13_spill] sm:$0xff] }
 0x1ce   :  { %313 = vrot.lane.b32.xlu1 %v2841_v43, %s2229_s11  ;;  %768 = vperm.xlu0 %2168, %v4134_v42  }
 0x1d2   :  { %321 = vrot.lane.b32.xlu1 %v2847_v1, %s2229_s11  ;;  %717 = vrot.lane.b32.xlu0 %v2812_v2, %s2234_s16 }
 0x1d6   :  { %393 = vrot.lane.b32.xlu1 %v2841_v43, %s2230_s12  ;;  %1389 = vperm.xlu0 %2168, %v4135_v35  }
 0x1da   :  { %401 = vrot.lane.b32.xlu1 %v2847_v1, %s2230_s12  ;;  %2169 = vset.pattern.permute.xlu0 %v4137_v53 }
 0x1db   :  { %848 = vperm.xlu0 %2169, %v4134_v42  }
 0x1de   :  { %473 = vrot.lane.b32.xlu1 %v2841_v43, %s2231_s13 }
 0x1df   :  { %797 = vrot.lane.b32.xlu0 %v2812_v2, %s2235_s17 }
 0x1e2   :  { %481 = vrot.lane.b32.xlu1 %v2847_v1, %s2231_s13 }
 0x1e3   :  { %1417 = vperm.xlu0 %2169, %v4135_v35  }
 0x1e6   :  { %553 = vrot.lane.b32.xlu1 %v2841_v43, %s2232_s14 }
 0x1e7   :  { %2170 = vset.pattern.permute.xlu0 %v2237_v52  ;;  %v4148_v52 = vld [vmem:[#allocation14_spill] sm:$0xff] }
 0x1e8   :  { %1441 = vperm.xlu0 %2170, %v4138_v0  }
 0x1ea   :  { %561 = vrot.lane.b32.xlu1 %v2847_v1, %s2232_s14 }
 0x1ee   :  { %633 = vrot.lane.b32.xlu1 %v2841_v43, %s2233_s15 }
 0x1f2   :  { %641 = vrot.lane.b32.xlu1 %v2847_v1, %s2233_s15 }
 0x1f6   :  { %713 = vrot.lane.b32.xlu1 %v2841_v43, %s2234_s16 }
 0x1fa   :  { %721 = vrot.lane.b32.xlu1 %v2847_v1, %s2234_s16 }
 0x1fe   :  { %793 = vrot.lane.b32.xlu1 %v2841_v43, %s2235_s17 }
 0x202   :  { %801 = vrot.lane.b32.xlu1 %v2847_v1, %s2235_s17 }
 0x206   :  { %872 = vperm.xlu1 %2171, %v4134_v42  }
 0x21b   :  { %v237_v57 = vpop.permute.xlu0 %236 }
 0x21c   :  { %v229_v59 = vpop.permute.xlu1 %228 }
 0x21f   :  { %v310_v44 = vpop.permute.xlu0 %309 }
 0x220   :  { %v2920_v20 = vpop.permute.xlu1 %389 }
 0x223   :  { %v318_v10 = vpop.permute.xlu0 %317 }
 0x224   :  { %v2922_v5 = vpop.permute.xlu1 %469 }
 0x227   :  { %v398_v40 = vpop.permute.xlu0 %397 }
 0x228   :  { %v2924_v19 = vpop.permute.xlu1 %549 }
 0x22b   :  { %v2930_v3 = vpop.permute.xlu0 %477 }
 0x22c   :  { %v2926_v37 = vpop.permute.xlu1 %629 }
 0x22f   :  { %v2934_v25 = vpop.permute.xlu0 %557 }
 0x230   :  { %v2928_v54 = vpop.permute.xlu1 %709 }
 0x234   :  { %v2932_v46 = vpop.permute.xlu1 %789 }
 0x235   :  { %4146 = vst [vmem:[#allocation6_spill] sm:$0xff] %v2932_v46 }
 0x238   :  { %v233_v42 = vpop.permute.xlu1 %232 }
 0x239   :  { %v248_v63 = vsel %vm244_vm1, %v233_v42, %v237_v57  ;;  %v250_v35 = vsel %vm244_vm1, %v229_v59, %v233_v42  ;;  %v4150_v42 = vld [vmem:[#allocation16_spill] sm:$0xff] }
 0x23a   :  { %v280_v53 = vmul.f32 %v4147_v13, %v250_v35  ;;  %v281_v0 = vmul.f32 %v4148_v52, %v248_v63  ;;  %v223_v63 = vmul.f32 %v216_v18, %v2841_v43  ;;  %v224_v52 = vmul.f32 %v216_v18, %v2812_v2 }
 0x23c   :  { %v241_v38 = vpop.permute.xlu1 %240  ;;  %v2942_v51 = vpop.permute.xlu0 %688  ;;  %v296_v45 = vmul.f32 %v2876_v29, %v280_v53  ;;  %v297_v24 = vmul.f32 %v2876_v29, %v281_v0  ;;  %v4152_v0 = vld [vmem:[#allocation18_spill] sm:$0xff] }
 0x23d   :  { %v246_v62 = vsel %vm244_vm1, %v237_v57, %v241_v38  ;;  %v252_v50 = vsel %vm244_vm1, %v241_v38, %v229_v59  ;;  %v4151_v59 = vld [vmem:[#allocation17_spill] sm:$0xff] }
 0x23e   :  { %v279_v17 = vmul.f32 %v4149_v21, %v252_v50  ;;  %v282_v39 = vmul.f32 %v4150_v42, %v246_v62  ;;  %v304_v50 = vadd.f32 %v296_v45, %v223_v63  ;;  %v305_v21 = vadd.f32 %v297_v24, %v224_v52 }
 0x240   :  { %v314_v35 = vpop.permute.xlu1 %313  ;;  %v2952_v13 = vpop.permute.xlu0 %637  ;;  %v295_v62 = vmul.f32 %v2876_v29, %v279_v17  ;;  %v298_v42 = vmul.f32 %v2876_v29, %v282_v39  ;;  %v4154_v39 = vld [vmem:[#allocation19_spill] sm:$0xff] }
 0x241   :  { %v327_v57 = vsel %vm323_vm2, %v314_v35, %v318_v10  ;;  %v329_v38 = vsel %vm323_vm2, %v310_v44, %v314_v35  ;;  %v225_v35 = vmul.f32 %v216_v18, %v2847_v1 }
 0x242   :  { %v360_v53 = vmul.f32 %v4151_v59, %v329_v38  ;;  %v361_v32 = vmul.f32 %v4152_v0, %v327_v57 }
 0x243   :  { %v306_v63 = vadd.f32 %v298_v42, %v225_v35 }
 0x244   :  { %v376_v26 = vmul.f32 %v2883_v31, %v360_v53  ;;  %v377_v46 = vmul.f32 %v2883_v31, %v361_v32  ;;  %v322_v2 = vpop.permute.xlu1 %321  ;;  %v2966_v12 = vpop.permute.xlu0 %1361  ;;  %v303_v32 = vadd.f32 %v295_v62, %v222_v55 }
 0x245   :  { %4153 = vst [vmem:[#allocation4_spill] sm:$0xff] %v2966_v12  ;;  %v325_v57 = vsel %vm323_vm2, %v318_v10, %v322_v2  ;;  %v331_v45 = vsel %vm323_vm2, %v322_v2, %v310_v44 }
 0x246   :  { %v384_v17 = vadd.f32 %v376_v26, %v304_v50  ;;  %v385_v24 = vadd.f32 %v377_v46, %v305_v21  ;;  %v359_v29 = vmul.f32 %v2530_v22, %v331_v45  ;;  %v362_v52 = vmul.f32 %v4154_v39, %v325_v57 }
 0x248   :  { %v375_v38 = vmul.f32 %v2883_v31, %v359_v29  ;;  %v378_v53 = vmul.f32 %v2883_v31, %v362_v52  ;;  %v394_v12 = vpop.permute.xlu1 %393 }
 0x249   :  { %v407_v18 = vsel %vm403_vm3, %v394_v12, %v398_v40  ;;  %v409_v2 = vsel %vm403_vm3, %v2920_v20, %v394_v12  ;;  %v2983_v26 = vpop.permute.xlu0 %768 }
 0x24a   :  { %v383_v21 = vadd.f32 %v375_v38, %v303_v32  ;;  %v386_v44 = vadd.f32 %v378_v53, %v306_v63  ;;  %v440_v10 = vmul.f32 %v2540_v27, %v409_v2  ;;  %v441_v55 = vmul.f32 %v2543_v28, %v407_v18 }
 0x24c   :  { %v456_v46 = vmul.f32 %v2893_v9, %v440_v10  ;;  %v457_v31 = vmul.f32 %v2893_v9, %v441_v55  ;;  %v402_v42 = vpop.permute.xlu1 %401 }
 0x24d   :  { %v405_v50 = vsel %vm403_vm3, %v398_v40, %v402_v42  ;;  %v411_v12 = vsel %vm403_vm3, %v402_v42, %v2920_v20  ;;  %v2994_v62 = vpop.permute.xlu0 %717 }
 0x24e   :  { %v464_v35 = vadd.f32 %v456_v46, %v384_v17  ;;  %v465_v57 = vadd.f32 %v457_v31, %v385_v24  ;;  %v439_v45 = vmul.f32 %v2554_v58, %v411_v12  ;;  %v442_v29 = vmul.f32 %v2557_v4, %v405_v50 }
 0x250   :  { %v455_v52 = vmul.f32 %v2893_v9, %v439_v45  ;;  %v458_v32 = vmul.f32 %v2893_v9, %v442_v29  ;;  %v474_v63 = vpop.permute.xlu1 %473 }
 0x251   :  { %v487_v40 = vsel %vm483_vm4, %v474_v63, %v2930_v3  ;;  %v489_v20 = vsel %vm483_vm4, %v2922_v5, %v474_v63  ;;  %v3006_v38 = vpop.permute.xlu0 %1389 }
 0x252   :  { %4155 = vst [vmem:[#allocation7_spill] sm:$0xff] %v3006_v38  ;;  %v463_v17 = vadd.f32 %v455_v52, %v383_v21  ;;  %v466_v24 = vadd.f32 %v458_v32, %v386_v44  ;;  %v520_v53 = vmul.f32 %v2560_v7, %v489_v20  ;;  %v521_v18 = vmul.f32 %v2563_v34, %v487_v40 }
 0x254   :  { %v536_v2 = vmul.f32 %v2905_v47, %v520_v53  ;;  %v537_v9 = vmul.f32 %v2905_v47, %v521_v18  ;;  %v482_v10 = vpop.permute.xlu1 %481 }
 0x255   :  { %v485_v55 = vsel %vm483_vm4, %v2930_v3, %v482_v10  ;;  %v491_v46 = vsel %vm483_vm4, %v482_v10, %v2922_v5 }
 0x256   :  { %v544_v31 = vadd.f32 %v536_v2, %v464_v35  ;;  %v545_v21 = vadd.f32 %v537_v9, %v465_v57  ;;  %v519_v44 = vmul.f32 %v2566_v16, %v491_v46  ;;  %v522_v42 = vmul.f32 %v2569_v15, %v485_v55  ;;  %v3020_v50 = vpop.permute.xlu0 %848 }
 0x258   :  { %v535_v12 = vmul.f32 %v2905_v47, %v519_v44  ;;  %v538_v45 = vmul.f32 %v2905_v47, %v522_v42  ;;  %v554_v29 = vpop.permute.xlu1 %553 }
 0x259   :  { %v567_v3 = vsel %vm563_vm5, %v554_v29, %v2934_v25  ;;  %v569_v5 = vsel %vm563_vm5, %v2924_v19, %v554_v29 }
 0x25a   :  { %v543_v35 = vadd.f32 %v535_v12, %v463_v17  ;;  %v546_v57 = vadd.f32 %v538_v45, %v466_v24  ;;  %v599_v52 = vmul.f32 %v2578_v11, %v569_v5  ;;  %v600_v32 = vmul.f32 %v2581_v6, %v567_v3  ;;  %v3034_v47 = vpop.permute.xlu0 %797 }
 0x25c   :  { %v615_v63 = vmul.f32 %v2912_v56, %v599_v52  ;;  %v616_v40 = vmul.f32 %v2912_v56, %v600_v32  ;;  %v562_v20 = vpop.permute.xlu1 %561 }
 0x25d   :  { %v565_v53 = vsel %vm563_vm5, %v2934_v25, %v562_v20  ;;  %v571_v17 = vsel %vm563_vm5, %v562_v20, %v2924_v19 }
 0x25e   :  { %v623_v24 = vadd.f32 %v615_v63, %v543_v35  ;;  %v624_v18 = vadd.f32 %v616_v40, %v544_v31  ;;  %v601_v2 = vmul.f32 %v2584_v33, %v565_v53  ;;  %v602_v9 = vmul.f32 %v2587_v23, %v571_v17  ;;  %v3052_v12 = vpop.permute.xlu0 %1417 }
 0x25f   :  { %4156 = vst [vmem:[#allocation8_spill] sm:$0xff] %v3052_v12 }
 0x260   :  { %v617_v10 = vmul.f32 %v2912_v56, %v601_v2  ;;  %v618_v55 = vmul.f32 %v2912_v56, %v602_v9  ;;  %v634_v46 = vpop.permute.xlu1 %633 }
 0x261   :  { %v647_v44 = vsel %vm643_vm6, %v634_v46, %v2952_v13  ;;  %v649_v25 = vsel %vm643_vm6, %v2926_v37, %v634_v46  ;;  %v962_v19 = vpop.f32.mrf.mxu0 }
 0x262   :  { %v625_v42 = vadd.f32 %v617_v10, %v545_v21  ;;  %v626_v31 = vadd.f32 %v618_v55, %v546_v57  ;;  %v679_v45 = vmul.f32 %v2600_v49, %v649_v25  ;;  %v680_v29 = vmul.f32 %v2603_v30, %v647_v44 }
 0x263   :  { %v964_v3 = vpop.f32.mrf.mxu0  ;;  %v1442_v10 = vpop.permute.xlu0 %1441 }
 0x264   :  { %v695_v56 = vmul.f32 %v2942_v51, %v679_v45  ;;  %v696_v5 = vmul.f32 %v2942_v51, %v680_v29  ;;  %v642_v35 = vpop.permute.xlu1 %641 }
 0x265   :  { %v645_v52 = vsel %vm643_vm6, %v2952_v13, %v642_v35  ;;  %v651_v21 = vsel %vm643_vm6, %v642_v35, %v2926_v37  ;;  %v1033_v57 = vpop.f32.mrf.mxu1  ;;  %v1107_v32 = vpop.f32.mrf.mxu0 }
 0x266   :  { %v703_v63 = vadd.f32 %v695_v56, %v623_v24  ;;  %v704_v40 = vadd.f32 %v696_v5, %v624_v18  ;;  %v681_v20 = vmul.f32 %v4122_v60, %v645_v52  ;;  %v682_v53 = vmul.f32 %v4123_v48, %v651_v21 }
 0x267   :  { %v1108_v17 = vadd.f32 %v1107_v32, %v962_v19  ;;  %v1035_v2 = vpop.f32.mrf.mxu1  ;;  %v1109_v9 = vpop.f32.mrf.mxu0  ;;  %v1445_v21 = vmul.f32 %v1442_v10, %v2841_v43 }
 0x268   :  { %v697_v55 = vmul.f32 %v2942_v51, %v681_v20  ;;  %v698_v13 = vmul.f32 %v2942_v51, %v682_v53  ;;  %v714_v46 = vpop.permute.xlu1 %713  ;;  %v1110_v44 = vadd.f32 %v1109_v9, %v964_v3  ;;  %v1444_v51 = vmul.f32 %v1442_v10, %v2810_v41 }
 0x269   :  { %v1188_v37 = vadd.f32 %v2901_v8, %v1108_v17  ;;  %v727_v24 = vsel %vm723_vm7, %v714_v46, %v2994_v62  ;;  %v729_v18 = vsel %vm723_vm7, %v2928_v54, %v714_v46  ;;  %v1178_v25 = vpop.f32.mrf.mxu1 }
 0x26a   :  { %v705_v19 = vadd.f32 %v697_v55, %v625_v42  ;;  %v706_v45 = vadd.f32 %v698_v13, %v626_v31  ;;  %v759_v29 = vmul.f32 %v2622_v36, %v729_v18  ;;  %v760_v56 = vmul.f32 %v2625_v14, %v727_v24  ;;  %v4157_v55 = vld [vmem:[#allocation22_spill] sm:$0xff]  ;;  %v4159_v18 = vld [vmem:[#allocation20_spill] sm:$0xff] }
 0x26b   :  { %v3078_v3 = vmax.f32 %v1188_v37, 0.0  ;;  %v1189_v5 = vadd.f32 %v2901_v8, %v1110_v44  ;;  %v1179_v35 = vadd.f32 %v1178_v25, %v1033_v57  ;;  %v1180_v52 = vpop.f32.mrf.mxu1  ;;  %v4158_v44 = vld [vmem:[#allocation23_spill] sm:$0xff]  ;;  %v1446_v25 = vmul.f32 %v1442_v10, %v4159_v18 }
 0x26c   :  { %v775_v32 = vmul.f32 %v2983_v26, %v759_v29  ;;  %v776_v20 = vmul.f32 %v2983_v26, %v760_v56  ;;  %v1181_v42 = vadd.f32 %v1180_v52, %v1035_v2  ;;  %v722_v31 = vpop.permute.xlu1 %721  ;;  %v4162_v52 = vld [vmem:[#allocation25_spill] sm:$0xff] }
 0x26d   :  { %v3084_v53 = vmax.f32 %v1189_v5, 0.0  ;;  %v1190_v17 = vadd.f32 %v2901_v8, %v1179_v35  ;;  %v725_v41 = vsel %vm723_vm7, %v2994_v62, %v722_v31  ;;  %v731_v57 = vsel %vm723_vm7, %v722_v31, %v2928_v54  ;;  %1204 = vrot.lane.b32.xlu1 %v3078_v3, %s2228_s10  ;;  %v4160_v5 = vld [vmem:[#allocation6_spill] sm:$0xff] }
 0x26e   :  { %v783_v43 = vadd.f32 %v775_v32, %v703_v63  ;;  %v784_v9 = vadd.f32 %v776_v20, %v704_v40  ;;  %v1191_v2 = vadd.f32 %v2901_v8, %v1181_v42  ;;  %v761_v13 = vmul.f32 %v4157_v55, %v725_v41  ;;  %v4163_v42 = vld [vmem:[#allocation11_spill] sm:$0xff] }
 0x26f   :  { %v3097_v46 = vmax.f32 %v1190_v17, 0.0  ;;  %v762_v37 = vmul.f32 %v4158_v44, %v731_v57  ;;  %v1448_v24 = vadd.f32 %v1444_v51, %v3078_v3  ;;  %v1449_v62 = vadd.f32 %v1445_v21, %v3084_v53 }
 0x270   :  { %v1447_v54 = vmul.f32 %v1442_v10, %v2847_v1  ;;  %v3104_v29 = vmax.f32 %v1191_v2, 0.0  ;;  %v777_v63 = vmul.f32 %v2983_v26, %v761_v13  ;;  %v794_v40 = vpop.permute.xlu1 %793  ;;  %v4161_v10 = vld [vmem:[#allocation24_spill] sm:$0xff] }
 0x271   :  { %v778_v8 = vmul.f32 %v2983_v26, %v762_v37  ;;  %v807_v56 = vsel %vm803_vm8, %v794_v40, %v3034_v47  ;;  %v809_v51 = vsel %vm803_vm8, %v4160_v5, %v794_v40  ;;  %1208 = vrot.lane.b32.xlu0 %v3097_v46, %s2228_s10  ;;  %1232 = vrot.lane.b32.xlu1 %v3078_v3, %s2229_s11 }
 0x272   :  { %v785_v1 = vadd.f32 %v777_v63, %v705_v19  ;;  %v839_v35 = vmul.f32 %v4161_v10, %v809_v51  ;;  %v840_v21 = vmul.f32 %v4162_v52, %v807_v56  ;;  %v1450_v26 = vadd.f32 %v1446_v25, %v3097_v46  ;;  %v4171_v25 = vld [vmem:[#allocation27_spill] sm:$0xff]  ;;  %v4225_v10 = vld [vmem:[#allocation16_spill] sm:$0xff] }
 0x273   :  { %v786_v32 = vadd.f32 %v778_v8, %v706_v45  ;;  %v1451_v20 = vadd.f32 %v1447_v54, %v3104_v29  ;;  %v3123_v31 = vadd.f32 %v4163_v42, %v1448_v24  ;;  %v3126_v17 = vadd.f32 %v4163_v42, %v1449_v62  ;;  %v4170_v62 = vld [vmem:[#allocation26_spill] sm:$0xff] }
 0x274   :  { %v855_v41 = vmul.f32 %v3020_v50, %v839_v35  ;;  %v856_v57 = vmul.f32 %v3020_v50, %v840_v21  ;;  %v802_v19 = vpop.permute.xlu1 %801  ;;  %v3131_v2 = vadd.f32 %v4163_v42, %v1450_v26  ;;  %v4174_v56 = vmov 12   ;;  %v3250_v35 = vld [vmem:[%s3990_s4 + $0x1f8] sm:$0xff] }
 0x275   :  { %4164 = vst [vmem:[#allocation2_spill] sm:$0xff] %v3123_v31  ;;  %4165 = vst [vmem:[#allocation17_spill] sm:$0xff] %v3126_v17  ;;  %v805_v45 = vsel %vm803_vm8, %v3034_v47, %v802_v19  ;;  %v811_v13 = vsel %vm803_vm8, %v802_v19, %v4160_v5  ;;  %1236 = vrot.lane.b32.xlu0 %v3097_v46, %s2229_s11  ;;  %1260 = vrot.lane.b32.xlu1 %v3078_v3, %s2230_s12  ;;  %v2215_v5 = vld [vmem:[%s3987_s2 + $0x10] sm:$0xff]  ;;  %v3255_v21 = vld [vmem:[%s3990_s4 + $0x78] sm:$0xff] }
 0x276   :  { %4166 = vst [vmem:[#allocation18_spill] sm:$0xff] %v3131_v2  ;;  %v3144_v37 = vadd.f32 %v4163_v42, %v1451_v20  ;;  %1481 = vst [vmem:[%s3989_s5 + $0x8] sm:$0xff] %v3126_v17  ;;  %v3154_v47 = vadd.f32 %v855_v41, %v783_v43  ;;  %v3156_v24 = vadd.f32 %v856_v57, %v784_v9  ;;  %2020 = vmatprep.subr.mxu1 %v3250_v35  ;;  %v3262_v26 = vld [vmem:[%s3990_s4 + $0x178] sm:$0xff]  ;;  %v3272_v20 = vld [vmem:[%s3990_s4 + $0x1f0] sm:$0xff] }
 0x277   :  { %1480 = vst [vmem:[%s3989_s5] sm:$0xff] %v3123_v31  ;;  %v841_v18 = vmul.f32 %v4170_v62, %v805_v45  ;;  %v842_v54 = vmul.f32 %v4171_v25, %v811_v13  ;;  %1482 = vst [vmem:[%s3989_s5 + $0x10] sm:$0xff] %v3131_v2  ;;  %v2173_v51 = vpack.i.bf16 %v3126_v17, %v3123_v31  ;;  %2021 = vmatpush3.msra.mxu1 %v3262_v26  ;;  %v3279_v42 = vld [vmem:[%s3990_s4 + $0x70] sm:$0xff]  ;;  %v3289_v57 = vld [vmem:[%s3990_s4 + $0xe8] sm:$0xff] }
 0x278   :  { %4167 = vst [vmem:[#allocation19_spill] sm:$0xff] %v3144_v37  ;;  %4168 = vst [vmem:[#allocation22_spill] sm:$0xff] %v3154_v47  ;;  %v2178_v8 = vpack.i.bf16 %v3144_v37, %v3131_v2  ;;  %v3284_v41 = vld [vmem:[%s3990_s4 + $0x170] sm:$0xff]  ;;  %2022 = vmatprep.subr.mxu1 %v3272_v20  ;;  %v3296_v19 = vld [vmem:[%s3990_s4 + $0x1e8] sm:$0xff] }
 0x279   :  { %4169 = vst [vmem:[#allocation23_spill] sm:$0xff] %v3156_v24  ;;  %1483 = vst [vmem:[%s3989_s5 + $0x18] sm:$0xff] %v3144_v37  ;;  %v857_v63 = vmul.f32 %v3020_v50, %v841_v18  ;;  %v858_v43 = vmul.f32 %v3020_v50, %v842_v54  ;;  %1264 = vrot.lane.b32.xlu0 %v3097_v46, %s2230_s12  ;;  %1288 = vrot.lane.b32.xlu1 %v3078_v3, %s2231_s13  ;;  %v2214_v50 = vld [vmem:[%s3987_s2 + $0x8] sm:$0xff]  ;;  %v4219_v2 = vld [vmem:[#allocation12_spill] sm:$0xff] }
 0x27a   :  { %4176 = vst [vmem:[#allocation28_spill] sm:$0xff] %v3250_v35  ;;  %4177 = vst [vmem:[#allocation29_spill] sm:$0xff] %v3255_v21  ;;  %v3301_v45 = vld [vmem:[%s3990_s4 + $0x68] sm:$0xff]  ;;  %2023 = vmatpush3.msra.mxu1 %v3284_v41  ;;  %v3313_v18 = vld [vmem:[%s3990_s4 + $0xe0] sm:$0xff]  ;;  %v1200_v12 = vmul.f32 %v4219_v2, %v3078_v3 }
 0x27b   :  { %v3174_v9 = vadd.f32 %v857_v63, %v785_v1  ;;  %v3176_v40 = vadd.f32 %v858_v43, %v786_v32  ;;  %v3245_v1 = vld [vmem:[%s3990_s4 + $0xf8] sm:$0xff]  ;;  %4178 = vst [vmem:[#allocation30_spill] sm:$0xff] %v3262_v26  ;;  %v3267_v32 = vld [vmem:[%s3990_s4 + $0xf0] sm:$0xff]  ;;  %4180 = vst [vmem:[#allocation32_spill] sm:$0xff] %v3272_v20  ;;  %2024 = vmatprep.subr.mxu1 %v3296_v19 }
 0x27c   :  { %4175 = vst [vmem:[#allocation11_spill] sm:$0xff] %v3245_v1  ;;  %1985 = vmatprep.subr.mxu0 %v3245_v1  ;;  %4179 = vst [vmem:[#allocation31_spill] sm:$0xff] %v3267_v32  ;;  %v3306_v13 = vld [vmem:[%s3990_s4 + $0x168] sm:$0xff]  ;;  %v3318_v54 = vld [vmem:[%s3990_s4 + $0x1e0] sm:$0xff] }
 0x27d   :  { %4172 = vst [vmem:[#allocation20_spill] sm:$0xff] %v3174_v9  ;;  %4173 = vst [vmem:[#allocation6_spill] sm:$0xff] %v3176_v40  ;;  %1292 = vrot.lane.b32.xlu0 %v3097_v46, %s2231_s13  ;;  %1316 = vrot.lane.b32.xlu1 %v3078_v3, %s2232_s14  ;;  %v3325_v63 = vld [vmem:[%s3990_s4 + $0x60] sm:$0xff]  ;;  %v4217_v35 = vld [vmem:[#allocation15_spill] sm:$0xff] }
 0x27e   :  { %1986 = vmatpush3.msra.mxu0 %v3255_v21  ;;  %4181 = vst [vmem:[#allocation33_spill] sm:$0xff] %v3279_v42  ;;  %4182 = vst [vmem:[#allocation34_spill] sm:$0xff] %v3284_v41  ;;  %v3330_v43 = vld [vmem:[%s3990_s4 + $0x160] sm:$0xff]  ;;  %2025 = vmatpush3.msra.mxu1 %v3306_v13  ;;  %v4218_v31 = vld [vmem:[#allocation3_spill] sm:$0xff] }
 0x27f   :  { %4183 = vst [vmem:[#allocation35_spill] sm:$0xff] %v3289_v57  ;;  %1987 = vmatprep.subr.mxu0 %v3267_v32  ;;  %4184 = vst [vmem:[#allocation36_spill] sm:$0xff] %v3296_v19  ;;  %2026 = vmatprep.subr.mxu1 %v3318_v54 }
 0x280   :  { %4185 = vst [vmem:[#allocation37_spill] sm:$0xff] %v3301_v45  ;;  %4186 = vst [vmem:[#allocation38_spill] sm:$0xff] %v3306_v13  ;;  %1988 = vmatpush3.msra.mxu0 %v3279_v42  ;;  %2027 = vmatpush3.msra.mxu1 %v3330_v43 }
 0x281   :  { %1320 = vrot.lane.b32.xlu0 %v3097_v46, %s2232_s14  ;;  %1344 = vrot.lane.b32.xlu1 %v3078_v3, %s2233_s15  ;;  %4187 = vst [vmem:[#allocation39_spill] sm:$0xff] %v3313_v18  ;;  %4188 = vst [vmem:[#allocation40_spill] sm:$0xff] %v3318_v54  ;;  %v3366_v54 = vld [vmem:[%s3990_s4 + $0x1d0] sm:$0xff] }
 0x282   :  { %1989 = vmatprep.subr.mxu0 %v3289_v57  ;;  %4189 = vst [vmem:[#allocation41_spill] sm:$0xff] %v3325_v63  ;;  %4190 = vst [vmem:[#allocation42_spill] sm:$0xff] %v3330_v43  ;;  %v3375_v43 = vld [vmem:[%s3990_s4 + $0x50] sm:$0xff] }
 0x283   :  { %1990 = vmatpush3.msra.mxu0 %v3301_v45  ;;  %4196 = vst [vmem:[#allocation48_spill] sm:$0xff] %v3366_v54  ;;  %4198 = vst [vmem:[#allocation50_spill] sm:$0xff] %v3375_v43 }
 0x284   :  { %1991 = vmatprep.subr.mxu0 %v3313_v18  ;;  %v3368_v18 = vpop.permute.xlu1 %872 }
 0x285   :  { %1348 = vrot.lane.b32.xlu0 %v3097_v46, %s2233_s15  ;;  %1400 = vrot.lane.b32.xlu1 %v3078_v3, %s2235_s17  ;;  %4197 = vst [vmem:[#allocation49_spill] sm:$0xff] %v3368_v18  ;;  %v4220_v18 = vld [vmem:[#allocation21_spill] sm:$0xff] }
 0x286   :  { %1992 = vmatpush3.msra.mxu0 %v3325_v63  ;;  %v3380_v63 = vld [vmem:[%s3990_s4 + $0x150] sm:$0xff] }
 0x287   :  { %4199 = vst [vmem:[#allocation51_spill] sm:$0xff] %v3380_v63 }
 0x289   :  { %1372 = vrot.lane.b32.xlu0 %v3078_v3, %s2234_s16  ;;  %1404 = vrot.lane.b32.xlu1 %v3097_v46, %s2235_s17 }
 0x28d   :  { %1376 = vrot.lane.b32.xlu0 %v3097_v46, %s2234_s16  ;;  %1206 = vrot.lane.b32.xlu1 %v3084_v53, %s2228_s10 }
 0x291   :  { %1402 = vrot.lane.b32.xlu0 %v3084_v53, %s2235_s17  ;;  %1210 = vrot.lane.b32.xlu1 %v3104_v29, %s2228_s10 }
 0x295   :  { %1406 = vrot.lane.b32.xlu0 %v3104_v29, %s2235_s17  ;;  %1234 = vrot.lane.b32.xlu1 %v3084_v53, %s2229_s11 }
 0x299   :  { %1461 = vperm.xlu0 %2170, %v2214_v50   ;;  %1238 = vrot.lane.b32.xlu1 %v3104_v29, %s2229_s11 }
 0x29d   :  { %2179 = vrot.lane.b32.xlu0 %v2178_v8, %s2232_s14  ;;  %1262 = vrot.lane.b32.xlu1 %v3084_v53, %s2230_s12  ;;  %v3342_v8 = vld [vmem:[%s3990_s4 + $0x1d8] sm:$0xff] }
 0x29e   :  { %2213 = vset.pattern.permute.xlu0 %v4174_v56  ;;  %4192 = vst [vmem:[#allocation44_spill] sm:$0xff] %v3342_v8  ;;  %2028 = vmatprep.subr.mxu1 %v3342_v8  ;;  %v3392_v8 = vld [vmem:[%s3990_s4 + $0x1c8] sm:$0xff] }
 0x29f   :  { %4201 = vst [vmem:[#allocation53_spill] sm:$0xff] %v3392_v8 }
 0x2a1   :  { %1266 = vrot.lane.b32.xlu1 %v3104_v29, %s2230_s12 }
 0x2a5   :  { %1290 = vrot.lane.b32.xlu1 %v3084_v53, %s2231_s13 }
 0x2a9   :  { %1294 = vrot.lane.b32.xlu1 %v3104_v29, %s2231_s13 }
 0x2ad   :  { %1318 = vrot.lane.b32.xlu1 %v3084_v53, %s2232_s14 }
 0x2b1   :  { %1322 = vrot.lane.b32.xlu1 %v3104_v29, %s2232_s14 }
 0x2b5   :  { %1346 = vrot.lane.b32.xlu1 %v3084_v53, %s2233_s15 }
 0x2b9   :  { %1350 = vrot.lane.b32.xlu1 %v3104_v29, %s2233_s15 }
 0x2bd   :  { %1374 = vrot.lane.b32.xlu1 %v3084_v53, %s2234_s16 }
 0x2c1   :  { %1378 = vrot.lane.b32.xlu1 %v3104_v29, %s2234_s16 }
 0x2c5   :  { %1429 = vperm.xlu1 %2171, %v2215_v5   ;;  %v3354_v5 = vld [vmem:[%s3990_s4 + $0x158] sm:$0xff] }
 0x2c6   :  { %4194 = vst [vmem:[#allocation46_spill] sm:$0xff] %v3354_v5  ;;  %2029 = vmatpush3.msra.mxu1 %v3354_v5  ;;  %v3404_v5 = vld [vmem:[%s3990_s4 + $0x148] sm:$0xff] }
 0x2c7   :  { %2030 = vmatprep.subr.mxu1 %v3366_v54  ;;  %4203 = vst [vmem:[#allocation55_spill] sm:$0xff] %v3404_v5  ;;  %v3416_v54 = vld [vmem:[%s3990_s4 + $0x1c0] sm:$0xff] }
 0x2c8   :  { %2031 = vmatpush3.msra.mxu1 %v3380_v63  ;;  %4205 = vst [vmem:[#allocation57_spill] sm:$0xff] %v3416_v54  ;;  %v3428_v63 = vld [vmem:[%s3990_s4 + $0x140] sm:$0xff] }
 0x2c9   :  { %2172 = vset.pattern.permute.xlu1 %v4174_v56  ;;  %v3349_v56 = vld [vmem:[%s3990_s4 + $0x58] sm:$0xff]  ;;  %2032 = vmatprep.subr.mxu1 %v3392_v8  ;;  %4207 = vst [vmem:[#allocation59_spill] sm:$0xff] %v3428_v63 }
 0x2ca   :  { %1473 = vperm.xlu1 %2172, %v2214_v50   ;;  %v3337_v50 = vld [vmem:[%s3990_s4 + $0xd8] sm:$0xff]  ;;  %4193 = vst [vmem:[#allocation45_spill] sm:$0xff] %v3349_v56  ;;  %2033 = vmatpush3.msra.mxu1 %v3404_v5 }
 0x2cb   :  { %4191 = vst [vmem:[#allocation43_spill] sm:$0xff] %v3337_v50  ;;  %1993 = vmatprep.subr.mxu0 %v3337_v50  ;;  %v3387_v50 = vld [vmem:[%s3990_s4 + $0xc8] sm:$0xff]  ;;  %v3440_v8 = vld [vmem:[%s3990_s4 + $0x1b8] sm:$0xff]  ;;  %2034 = vmatprep.subr.mxu1 %v3416_v54  ;;  %v3464_v54 = vld [vmem:[%s3990_s4 + $0x1b0] sm:$0xff] }
 0x2cc   :  { %1994 = vmatpush3.msra.mxu0 %v3349_v56  ;;  %4200 = vst [vmem:[#allocation52_spill] sm:$0xff] %v3387_v50  ;;  %v3399_v56 = vld [vmem:[%s3990_s4 + $0x48] sm:$0xff]  ;;  %4209 = vst [vmem:[#allocation61_spill] sm:$0xff] %v3440_v8  ;;  %v3452_v5 = vld [vmem:[%s3990_s4 + $0x138] sm:$0xff]  ;;  %2035 = vmatpush3.msra.mxu1 %v3428_v63 }
 0x2cd   :  { %4202 = vst [vmem:[#allocation54_spill] sm:$0xff] %v3399_v56  ;;  %4211 = vst [vmem:[#allocation63_spill] sm:$0xff] %v3452_v5  ;;  %2036 = vmatprep.subr.mxu1 %v3440_v8  ;;  %v3476_v63 = vld [vmem:[%s3990_s4 + $0x130] sm:$0xff] }
 0x2ce   :  { %2174 = vrot.lane.b32.xlu1 %v2173_v51, %s2232_s14  ;;  %v3361_v51 = vld [vmem:[%s3990_s4 + $0xd0] sm:$0xff]  ;;  %4213 = vst [vmem:[#allocation65_spill] sm:$0xff] %v3464_v54  ;;  %4215 = vst [vmem:[#allocation67_spill] sm:$0xff] %v3476_v63  ;;  %2037 = vmatpush3.msra.mxu1 %v3452_v5 }
 0x2cf   :  { %4195 = vst [vmem:[#allocation47_spill] sm:$0xff] %v3361_v51  ;;  %1995 = vmatprep.subr.mxu0 %v3361_v51  ;;  %v3411_v51 = vld [vmem:[%s3990_s4 + $0xc0] sm:$0xff]  ;;  %2038 = vmatprep.subr.mxu1 %v3464_v54 }
 0x2d0   :  { %1996 = vmatpush3.msra.mxu0 %v3375_v43  ;;  %4204 = vst [vmem:[#allocation56_spill] sm:$0xff] %v3411_v51  ;;  %v3423_v43 = vld [vmem:[%s3990_s4 + $0x40] sm:$0xff]  ;;  %2039 = vmatpush3.msra.mxu1 %v3476_v63  ;;  %v4216_v63 = vld [vmem:[#allocation13_spill] sm:$0xff] }
 0x2d1   :  { %1997 = vmatprep.subr.mxu0 %v3387_v50  ;;  %4206 = vst [vmem:[#allocation58_spill] sm:$0xff] %v3423_v43  ;;  %v3435_v50 = vld [vmem:[%s3990_s4 + $0xb8] sm:$0xff] }
 0x2d2   :  { %1998 = vmatpush3.msra.mxu0 %v3399_v56  ;;  %4208 = vst [vmem:[#allocation60_spill] sm:$0xff] %v3435_v50  ;;  %v3447_v56 = vld [vmem:[%s3990_s4 + $0x38] sm:$0xff] }
 0x2d3   :  { %1999 = vmatprep.subr.mxu0 %v3411_v51  ;;  %4210 = vst [vmem:[#allocation62_spill] sm:$0xff] %v3447_v56  ;;  %v3459_v51 = vld [vmem:[%s3990_s4 + $0xb0] sm:$0xff] }
 0x2d4   :  { %2000 = vmatpush3.msra.mxu0 %v3423_v43  ;;  %4212 = vst [vmem:[#allocation64_spill] sm:$0xff] %v3459_v51  ;;  %v3471_v43 = vld [vmem:[%s3990_s4 + $0x30] sm:$0xff] }
 0x2d5   :  { %2001 = vmatprep.subr.mxu0 %v3435_v50  ;;  %4214 = vst [vmem:[#allocation66_spill] sm:$0xff] %v3471_v43 }
 0x2d6   :  { %2002 = vmatpush3.msra.mxu0 %v3447_v56 }
 0x2d7   :  { %2003 = vmatprep.subr.mxu0 %v3459_v51 }
 0x2d8   :  { %2004 = vmatpush3.msra.mxu0 %v3471_v43 }
 0x2df   :  { %v1205_v13 = vpop.permute.xlu1 %1204 }
 0x2e3   :  { %v1233_v45 = vpop.permute.xlu1 %1232  ;;  %v1209_v57 = vpop.permute.xlu0 %1208 }
 0x2e7   :  { %v1261_v8 = vpop.permute.xlu1 %1260  ;;  %v1237_v56 = vpop.permute.xlu0 %1236 }
 0x2eb   :  { %v1289_v50 = vpop.permute.xlu1 %1288  ;;  %v3492_v5 = vpop.permute.xlu0 %1264 }
 0x2ef   :  { %v3484_v19 = vpop.permute.xlu1 %1316  ;;  %v3499_v21 = vpop.permute.xlu0 %1292 }
 0x2f3   :  { %v3486_v41 = vpop.permute.xlu1 %1344  ;;  %v3511_v24 = vpop.permute.xlu0 %1320 }
 0x2f7   :  { %v3488_v42 = vpop.permute.xlu1 %1400 }
 0x2fb   :  { %v3490_v20 = vpop.permute.xlu1 %1404 }
 0x2ff   :  { %v1207_v51 = vpop.permute.xlu1 %1206 }
 0x300   :  { %v1214_v43 = vsel %vm244_vm1, %v1205_v13, %v1207_v51 }
 0x301   :  { %v1217_v32 = vmul.f32 %v1214_v43, %v4216_v63  ;;  %v1201_v63 = vmul.f32 %v4219_v2, %v3084_v53  ;;  %v3520_v53 = vpop.permute.xlu0 %1348 }
 0x303   :  { %v1211_v54 = vpop.permute.xlu1 %1210  ;;  %v1225_v17 = vmul.f32 %v4218_v31, %v1217_v32 }
 0x304   :  { %v1215_v26 = vsel %vm244_vm1, %v1211_v54, %v1205_v13 }
 0x305   :  { %v1216_v1 = vmul.f32 %v1215_v26, %v4217_v35  ;;  %v1229_v26 = vadd.f32 %v1225_v17, %v1201_v63  ;;  %v4221_v17 = vld [vmem:[#allocation9_spill] sm:$0xff] }
 0x307   :  { %v1235_v37 = vpop.permute.xlu1 %1234  ;;  %v1224_v40 = vmul.f32 %v4218_v31, %v1216_v1 }
 0x308   :  { %v1242_v9 = vsel %vm323_vm2, %v1233_v45, %v1235_v37 }
 0x309   :  { %v1228_v43 = vadd.f32 %v1224_v40, %v1200_v12  ;;  %v1245_v13 = vmul.f32 %v1242_v9, %v4151_v59 }
 0x30b   :  { %v1239_v35 = vpop.permute.xlu1 %1238  ;;  %v1253_v32 = vmul.f32 %v4220_v18, %v1245_v13 }
 0x30c   :  { %v1243_v3 = vsel %vm323_vm2, %v1239_v35, %v1233_v45 }
 0x30d   :  { %v1244_v1 = vmul.f32 %v1243_v3, %v2530_v22  ;;  %v1257_v47 = vadd.f32 %v1253_v32, %v1229_v26  ;;  %v3527_v26 = vpop.permute.xlu0 %1372 }
 0x30f   :  { %v1252_v25 = vmul.f32 %v4220_v18, %v1244_v1  ;;  %v1263_v62 = vpop.permute.xlu1 %1262 }
 0x310   :  { %v1270_v12 = vsel %vm403_vm3, %v1261_v8, %v1263_v62 }
 0x311   :  { %v1256_v59 = vadd.f32 %v1252_v25, %v1228_v43  ;;  %v1273_v9 = vmul.f32 %v1270_v12, %v2540_v27  ;;  %v4222_v43 = vld [vmem:[#allocation10_spill] sm:$0xff] }
 0x313   :  { %v1281_v40 = vmul.f32 %v4221_v17, %v1273_v9  ;;  %v1267_v63 = vpop.permute.xlu1 %1266 }
 0x314   :  { %v1271_v45 = vsel %vm403_vm3, %v1267_v63, %v1261_v8 }
 0x315   :  { %v1285_v13 = vadd.f32 %v1281_v40, %v1257_v47  ;;  %v1272_v22 = vmul.f32 %v1271_v45, %v2554_v58  ;;  %v3536_v47 = vpop.permute.xlu0 %1376 }
 0x317   :  { %v1280_v32 = vmul.f32 %v4221_v17, %v1272_v22  ;;  %v1291_v3 = vpop.permute.xlu1 %1290 }
 0x318   :  { %v1298_v1 = vsel %vm483_vm4, %v1289_v50, %v1291_v3 }
 0x319   :  { %v1284_v25 = vadd.f32 %v1280_v32, %v1256_v59  ;;  %v1301_v27 = vmul.f32 %v1298_v1, %v2560_v7  ;;  %v1213_v59 = vsel %vm244_vm1, %v1207_v51, %v1209_v57  ;;  %v1212_v32 = vsel %vm244_vm1, %v1209_v57, %v1211_v54  ;;  %v4224_v51 = vld [vmem:[#allocation5_spill] sm:$0xff] }
 0x31a   :  { %v1219_v38 = vmul.f32 %v1212_v32, %v4225_v10  ;;  %v1269_v57 = vsel %vm403_vm3, %v1263_v62, %v3492_v5  ;;  %v1297_v62 = vsel %vm483_vm4, %v1291_v3, %v3499_v21 }
 0x31b   :  { %v1309_v12 = vmul.f32 %v4222_v43, %v1301_v27  ;;  %v1295_v9 = vpop.permute.xlu1 %1294  ;;  %v1274_v10 = vmul.f32 %v1269_v57, %v2543_v28 }
 0x31c   :  { %v1299_v8 = vsel %vm483_vm4, %v1295_v9, %v1289_v50 }
 0x31d   :  { %v3538_v58 = vadd.f32 %v1309_v12, %v1285_v13  ;;  %v1300_v40 = vmul.f32 %v1299_v8, %v2566_v16  ;;  %v4223_v13 = vld [vmem:[#allocation14_spill] sm:$0xff]  ;;  %v1403_v12 = vpop.permute.xlu0 %1402  ;;  %v1241_v16 = vsel %vm323_vm2, %v1235_v37, %v1237_v56  ;;  %v1240_v8 = vsel %vm323_vm2, %v1237_v56, %v1239_v35 }
 0x31e   :  { %v1218_v27 = vmul.f32 %v1213_v59, %v4223_v13  ;;  %v1268_v37 = vsel %vm403_vm3, %v3492_v5, %v1267_v63  ;;  %v3581_v5 = vsel %vm803_vm8, %v1403_v12, %v3490_v20  ;;  %v1410_v63 = vsel %vm803_vm8, %v3488_v42, %v1403_v12 }
 0x31f   :  { %v1308_v45 = vmul.f32 %v4222_v43, %v1300_v40  ;;  %v1319_v22 = vpop.permute.xlu1 %1318 }
 0x320   :  { %v1326_v7 = vsel %vm563_vm5, %v3484_v19, %v1319_v22  ;;  %v1226_v56 = vmul.f32 %v4218_v31, %v1218_v27 }
 0x321   :  { %v1312_v50 = vadd.f32 %v1308_v45, %v1284_v25  ;;  %v1328_v1 = vmul.f32 %v1326_v7, %v2578_v11  ;;  %v1246_v11 = vmul.f32 %v1241_v16, %v4152_v0  ;;  %v1247_v25 = vmul.f32 %v1240_v8, %v4154_v39  ;;  %v1407_v28 = vpop.permute.xlu0 %1406 }
 0x322   :  { %v1227_v45 = vmul.f32 %v4218_v31, %v1219_v38  ;;  %v1296_v0 = vsel %vm483_vm4, %v3499_v21, %v1295_v9  ;;  %v1202_v39 = vmul.f32 %v4219_v2, %v3097_v46  ;;  %v1203_v38 = vmul.f32 %v4219_v2, %v3104_v29 }
 0x323   :  { %v1336_v40 = vmul.f32 %v4224_v51, %v1328_v1  ;;  %v1323_v52 = vpop.permute.xlu1 %1322  ;;  %v1275_v31 = vmul.f32 %v1268_v37, %v2557_v4  ;;  %v1254_v21 = vmul.f32 %v4220_v18, %v1246_v11  ;;  %v1255_v3 = vmul.f32 %v4220_v18, %v1247_v25 }
 0x324   :  { %v1325_v46 = vsel %vm563_vm5, %v1319_v22, %v3511_v24  ;;  %v1302_v9 = vmul.f32 %v1297_v62, %v2563_v34  ;;  %v1303_v59 = vmul.f32 %v1296_v0, %v2569_v15  ;;  %v1324_v4 = vsel %vm563_vm5, %v3511_v24, %v1323_v52 }
 0x325   :  { %v3560_v54 = vadd.f32 %v1336_v40, %v1312_v50  ;;  %v1327_v29 = vsel %vm563_vm5, %v1323_v52, %v3484_v19  ;;  %v1230_v7 = vadd.f32 %v1226_v56, %v1202_v39  ;;  %v1231_v32 = vadd.f32 %v1227_v45, %v1203_v38 }
 0x326   :  { %v1408_v18 = vsel %vm803_vm8, %v3490_v20, %v1407_v28  ;;  %v1282_v22 = vmul.f32 %v4221_v17, %v1274_v10  ;;  %v1283_v34 = vmul.f32 %v4221_v17, %v1275_v31  ;;  %v1329_v15 = vmul.f32 %v1325_v46, %v2581_v6  ;;  %v4227_v31 = vld [vmem:[#allocation7_spill] sm:$0xff]  ;;  %v4228_v46 = vld [vmem:[#allocation24_spill] sm:$0xff] }
 0x327   :  { %v1347_v35 = vpop.permute.xlu1 %1346  ;;  %v1330_v19 = vmul.f32 %v1324_v4, %v2584_v33  ;;  %v1331_v50 = vmul.f32 %v1327_v29, %v2587_v23  ;;  %v1258_v17 = vadd.f32 %v1254_v21, %v1230_v7  ;;  %v1259_v1 = vadd.f32 %v1255_v3, %v1231_v32 }
 0x328   :  { %v1353_v24 = vsel %vm643_vm6, %v1347_v35, %v3520_v53  ;;  %v1354_v52 = vsel %vm643_vm6, %v3486_v41, %v1347_v35  ;;  %v1310_v13 = vmul.f32 %v4222_v43, %v1302_v9  ;;  %v1311_v27 = vmul.f32 %v4222_v43, %v1303_v59  ;;  %v4229_v59 = vld [vmem:[#allocation25_spill] sm:$0xff] }
 0x329   :  { %v1356_v16 = vmul.f32 %v1354_v52, %v2600_v49  ;;  %v1357_v33 = vmul.f32 %v1353_v24, %v2603_v30  ;;  %v1287_v8 = vadd.f32 %v1283_v34, %v1259_v1  ;;  %v1411_v49 = vsel %vm803_vm8, %v1407_v28, %v3488_v42  ;;  %v4232_v34 = vld [vmem:[#allocation22_spill] sm:$0xff]  ;;  %v1462_v52 = vpop.permute.xlu0 %1461 }
 0x32a   :  { %v1337_v30 = vmul.f32 %v4224_v51, %v1329_v15  ;;  %v1338_v43 = vmul.f32 %v4224_v51, %v1330_v19  ;;  %v1339_v11 = vmul.f32 %v4224_v51, %v1331_v50  ;;  %v1412_v9 = vmul.f32 %v1410_v63, %v4228_v46  ;;  %v4233_v15 = vld [vmem:[#allocation49_spill] sm:$0xff]  ;;  %v4236_v1 = vld [vmem:[#allocation6_spill] sm:$0xff] }
 0x32b   :  { %v1351_v2 = vpop.permute.xlu1 %1350  ;;  %v1315_v37 = vadd.f32 %v1311_v27, %v1287_v8  ;;  %v1413_v4 = vmul.f32 %v3581_v5, %v4229_v59  ;;  %v879_v24 = vadd.f32 %v4233_v15, %v4232_v34  ;;  %v3730_v46 = vld [vmem:[%s3990_s4 + $0x98] sm:$0xff] }
 0x32c   :  { %v1352_v20 = vsel %vm643_vm6, %v3520_v53, %v1351_v2  ;;  %v1355_v6 = vsel %vm643_vm6, %v1351_v2, %v3486_v41  ;;  %v1286_v41 = vadd.f32 %v1282_v22, %v1258_v17  ;;  %v1341_v39 = vadd.f32 %v1337_v30, %v3538_v58  ;;  %v4235_v17 = vld [vmem:[#allocation20_spill] sm:$0xff] }
 0x32d   :  { %v1358_v40 = vmul.f32 %v1352_v20, %v4122_v60  ;;  %v1359_v57 = vmul.f32 %v1355_v6, %v4123_v48  ;;  %v4226_v60 = vld [vmem:[#allocation4_spill] sm:$0xff]  ;;  %v1343_v28 = vadd.f32 %v1339_v11, %v1315_v37  ;;  %v4234_v6 = vld [vmem:[#allocation23_spill] sm:$0xff] }
 0x32e   :  { %v1314_v25 = vadd.f32 %v1310_v13, %v1286_v41  ;;  %v1364_v10 = vmul.f32 %v4226_v60, %v1356_v16  ;;  %v1365_v48 = vmul.f32 %v4226_v60, %v1357_v33  ;;  %v880_v5 = vadd.f32 %v4233_v15, %v4234_v6  ;;  %v4237_v13 = vld [vmem:[#allocation8_spill] sm:$0xff] }
 0x32f   :  { %v1375_v12 = vpop.permute.xlu1 %1374  ;;  %v1366_v51 = vmul.f32 %v4226_v60, %v1358_v40  ;;  %v1367_v0 = vmul.f32 %v4226_v60, %v1359_v57  ;;  %v1420_v27 = vmul.f32 %v4237_v13, %v1412_v9  ;;  %v3682_v60 = vld [vmem:[%s3990_s4 + $0xa8] sm:$0xff]  ;;  %v3735_v9 = vld [vmem:[%s3990_s4 + $0x198] sm:$0xff] }
 0x330   :  { %v1381_v23 = vsel %vm723_vm7, %v1375_v12, %v3536_v47  ;;  %v1382_v53 = vsel %vm723_vm7, %v3527_v26, %v1375_v12  ;;  %v1342_v38 = vadd.f32 %v1338_v43, %v1314_v25  ;;  %v1368_v58 = vadd.f32 %v1364_v10, %v3560_v54  ;;  %v3677_v25 = vpop.permute.xlu0 %2179  ;;  %v3687_v10 = vld [vmem:[%s3990_s4 + $0x1a8] sm:$0xff]  ;;  %2005 = vmatprep.subr.mxu0 %v3682_v60 }
 0x331   :  { %v1384_v56 = vmul.f32 %v1382_v53, %v2622_v36  ;;  %v1385_v35 = vmul.f32 %v1381_v23, %v2625_v14  ;;  %v1369_v7 = vadd.f32 %v1365_v48, %v1341_v39  ;;  %v1371_v22 = vadd.f32 %v1367_v0, %v1343_v28  ;;  %v3692_v48 = vld [vmem:[%s3990_s4 + $0x28] sm:$0xff]  ;;  %2040 = vmatprep.subr.mxu1 %v3687_v10 }
 0x332   :  { %v1370_v32 = vadd.f32 %v1366_v51, %v1342_v38  ;;  %v882_v54 = vadd.f32 %v4233_v15, %v4236_v1  ;;  %v1421_v12 = vmul.f32 %v4237_v13, %v1413_v4  ;;  %v887_v23 = vmax.f32 %v879_v24, 0.0  ;;  %v3699_v0 = vld [vmem:[%s3990_s4 + $0x128] sm:$0xff]  ;;  %2006 = vmatpush3.msra.mxu0 %v3692_v48  ;;  %v3767_v24 = vld [vmem:[%s3990_s4 + $0x190] sm:$0xff] }
 0x333   :  { %v1379_v45 = vpop.permute.xlu1 %1378  ;;  %v1392_v21 = vmul.f32 %v4227_v31, %v1384_v56  ;;  %v888_v57 = vmax.f32 %v880_v5, 0.0  ;;  %2041 = vmatpush3.msra.mxu1 %v3699_v0  ;;  %v3808_v5 = vld [vmem:[%s3990_s4 + $0x88] sm:$0xff] }
 0x334   :  { %v1380_v42 = vsel %vm723_vm7, %v3536_v47, %v1379_v45  ;;  %v1383_v62 = vsel %vm723_vm7, %v1379_v45, %v3527_v26  ;;  %v1393_v47 = vmul.f32 %v4227_v31, %v1385_v35  ;;  %v890_v30 = vmax.f32 %v882_v54, 0.0  ;;  %v3820_v54 = vld [vmem:[%s3990_s4 + $0x8] sm:$0xff] }
 0x335   :  { %v1386_v36 = vmul.f32 %v1380_v42, %v4157_v55  ;;  %v1387_v14 = vmul.f32 %v1383_v62, %v4158_v44  ;;  %v4230_v55 = vld [vmem:[#allocation26_spill] sm:$0xff]  ;;  %v4231_v44 = vld [vmem:[#allocation27_spill] sm:$0xff]  ;;  %v1396_v19 = vadd.f32 %v1392_v21, %v1368_v58  ;;  %v1464_v43 = vmul.f32 %v1462_v52, %v887_v23  ;;  %v3746_v58 = vld [vmem:[%s3990_s4 + $0x118] sm:$0xff] }
 0x336   :  { %v1414_v29 = vmul.f32 %v1408_v18, %v4230_v55  ;;  %v1415_v2 = vmul.f32 %v1411_v49, %v4231_v44  ;;  %v1397_v50 = vadd.f32 %v1393_v47, %v1369_v7  ;;  %v881_v18 = vadd.f32 %v4233_v15, %v4235_v17  ;;  %v3716_v21 = vld [vmem:[%s3990_s4 + $0x20] sm:$0xff]  ;;  %v3762_v15 = vld [vmem:[%s3990_s4 + $0x90] sm:$0xff]  ;;  %v3813_v17 = vld [vmem:[%s3990_s4 + $0x188] sm:$0xff] }
 0x337   :  { %v1394_v3 = vmul.f32 %v4227_v31, %v1386_v36  ;;  %v1395_v26 = vmul.f32 %v4227_v31, %v1387_v14  ;;  %v1424_v40 = vadd.f32 %v1420_v27, %v1396_v19  ;;  %v1465_v42 = vmul.f32 %v1462_v52, %v888_v57  ;;  %v3704_v36 = vld [vmem:[%s3990_s4 + $0xa0] sm:$0xff]  ;;  %v4239_v57 = vld [vmem:[#allocation17_spill] sm:$0xff] }
 0x338   :  { %v1422_v16 = vmul.f32 %v4237_v13, %v1414_v29  ;;  %v1423_v33 = vmul.f32 %v4237_v13, %v1415_v2  ;;  %v1425_v53 = vadd.f32 %v1421_v12, %v1397_v50  ;;  %v889_v49 = vmax.f32 %v881_v18, 0.0  ;;  %v3709_v14 = vld [vmem:[%s3990_s4 + $0x1a0] sm:$0xff]  ;;  %2007 = vmatprep.subr.mxu0 %v3704_v36  ;;  %v3741_v2 = vld [vmem:[%s3990_s4 + $0x18] sm:$0xff]  ;;  %v3781_v50 = vld [vmem:[%s3990_s4 + $0x110] sm:$0xff] }
 0x339   :  { %v1398_v20 = vadd.f32 %v1394_v3, %v1370_v32  ;;  %v1399_v63 = vadd.f32 %v1395_v26, %v1371_v22  ;;  %v1467_v51 = vmul.f32 %v1462_v52, %v890_v30  ;;  %v3721_v47 = vld [vmem:[%s3990_s4 + $0x120] sm:$0xff]  ;;  %v2182_v3 = vunpack.i.h.bf16 %v3677_v25  ;;  %2042 = vmatprep.subr.mxu1 %v3709_v14  ;;  %2008 = vmatpush3.msra.mxu0 %v3716_v21  ;;  %v3825_v13 = vld [vmem:[%s3990_s4 + $0x108] sm:$0xff] }
 0x33a   :  { %v1466_v62 = vmul.f32 %v1462_v52, %v889_v49  ;;  %v2181_v26 = vunpack.i.l.bf16 %v3677_v25  ;;  %2043 = vmatpush3.msra.mxu1 %v3721_v47  ;;  %2009 = vmatprep.subr.mxu0 %v3730_v46  ;;  %v3772_v52 = vld [vmem:[%s3990_s4 + $0x10] sm:$0xff]  ;;  %v4238_v27 = vld [vmem:[#allocation18_spill] sm:$0xff] }
 0x33b   :  { %v1426_v41 = vadd.f32 %v1422_v16, %v1398_v20  ;;  %v1427_v8 = vadd.f32 %v1423_v33, %v1399_v63  ;;  %2044 = vmatprep.subr.mxu1 %v3735_v9  ;;  %2010 = vmatpush3.msra.mxu0 %v3741_v2  ;;  %v3833_v16 = vld [vmem:[%s3990_s4 + $0x80] sm:$0xff] }
 0x33c   :  { %v1496_v19 = vsel %vm563_vm5, %v2181_v26, %v2182_v3  ;;  %2045 = vmatpush3.msra.mxu1 %v3746_v58  ;;  %2011 = vmatprep.subr.mxu0 %v3762_v15  ;;  %v3838_v33 = vld [vmem:[%s3990_s4 + $0x180] sm:$0xff] }
 0x33d   :  { %2046 = vmatprep.subr.mxu1 %v3767_v24  ;;  %2012 = vmatpush3.msra.mxu0 %v3772_v52  ;;  %v1502_v12 = vmax.f32 %v4238_v27, %v1496_v19  ;;  %v4240_v30 = vld [vmem:[#allocation2_spill] sm:$0xff] }
 0x33e   :  { %2047 = vmatpush3.msra.mxu1 %v3781_v50  ;;  %2013 = vmatprep.subr.mxu0 %v3808_v5 }
 0x33f   :  { %2048 = vmatprep.subr.mxu1 %v3813_v17  ;;  %2014 = vmatpush3.msra.mxu0 %v3820_v54 }
 0x340   :  { %v1430_v11 = vpop.permute.xlu1 %1429  ;;  %2049 = vmatpush3.msra.mxu1 %v3825_v13  ;;  %2015 = vmatprep.subr.mxu0 %v3833_v16 }
 0x341   :  { %v1432_v37 = vadd.f32 %v1430_v11, %v1424_v40  ;;  %v1433_v56 = vadd.f32 %v1430_v11, %v1425_v53  ;;  %v1434_v35 = vadd.f32 %v1430_v11, %v1426_v41  ;;  %v1435_v45 = vadd.f32 %v1430_v11, %v1427_v8  ;;  %v3851_v8 = vld [vmem:[%s3990_s4] sm:$0xff]  ;;  %v4241_v11 = vld [vmem:[#allocation19_spill] sm:$0xff]  ;;  %2050 = vmatprep.subr.mxu1 %v3838_v33 }
 0x342   :  { %v3856_v40 = vld [vmem:[%s3990_s4 + $0x100] sm:$0xff]  ;;  %2016 = vmatpush3.msra.mxu0 %v3851_v8 }
 0x343   :  { %v1436_v39 = vmax.f32 %v1432_v37, 0.0  ;;  %v1437_v38 = vmax.f32 %v1433_v56, 0.0  ;;  %v1438_v28 = vmax.f32 %v1434_v35, 0.0  ;;  %v1439_v31 = vmax.f32 %v1435_v45, 0.0  ;;  %2051 = vmatpush3.msra.mxu1 %v3856_v40  ;;  %v4242_v35 = vld [vmem:[#allocation11_spill] sm:$0xff]  ;;  %v4243_v45 = vld [vmem:[#allocation28_spill] sm:$0xff] }
 0x344   :  { %2055 = vmatprep.subr.mxu0 %v4242_v35  ;;  %2090 = vmatprep.subr.mxu1 %v4243_v45  ;;  %v4247_v35 = vld [vmem:[#allocation32_spill] sm:$0xff]  ;;  %v4248_v45 = vld [vmem:[#allocation33_spill] sm:$0xff] }
 0x345   :  { %v1469_v59 = vadd.f32 %v1465_v42, %v1437_v38  ;;  %v1470_v4 = vadd.f32 %v1466_v62, %v1438_v28  ;;  %v1471_v55 = vadd.f32 %v1467_v51, %v1439_v31  ;;  %v1474_v29 = vpop.permute.xlu1 %1473  ;;  %v1468_v44 = vadd.f32 %v1464_v43, %v1436_v39 }
 0x347   :  { %v3750_v7 = vadd.f32 %v1474_v29, %v1468_v44  ;;  %v3752_v32 = vadd.f32 %v1474_v29, %v1469_v59  ;;  %v3754_v22 = vadd.f32 %v1474_v29, %v1470_v4  ;;  %v3756_v34 = vadd.f32 %v1474_v29, %v1471_v55 }
 0x349   :  { %1484 = vst [vmem:[%s3989_s5 + $0x20] sm:$0xff] %v3750_v7  ;;  %1485 = vst [vmem:[%s3989_s5 + $0x28] sm:$0xff] %v3752_v32  ;;  %v2175_v20 = vpop.permute.xlu1 %2174  ;;  %v2188_v63 = vpack.i.bf16 %v3756_v34, %v3754_v22  ;;  %v2183_v6 = vpack.i.bf16 %v3752_v32, %v3750_v7 }
 0x34a   :  { %1486 = vst [vmem:[%s3989_s5 + $0x30] sm:$0xff] %v3754_v22  ;;  %1487 = vst [vmem:[%s3989_s5 + $0x38] sm:$0xff] %v3756_v34  ;;  %v2177_v18 = vunpack.i.h.bf16 %v2175_v20  ;;  %v2176_v1 = vunpack.i.l.bf16 %v2175_v20 }
 0x34b   :  { %2189 = vrot.lane.b32.xlu0 %v2188_v63, %s2232_s14  ;;  %2184 = vrot.lane.b32.xlu1 %v2183_v6, %s2232_s14 }
 0x34c   :  { %v1497_v23 = vsel %vm563_vm5, %v2177_v18, %v2181_v26  ;;  %v1498_v53 = vsel %vm563_vm5, %v2176_v1, %v2177_v18  ;;  %v1499_v41 = vsel %vm563_vm5, %v2182_v3, %v2176_v1 }
 0x34d   :  { %v1501_v49 = vmax.f32 %v4239_v57, %v1497_v23  ;;  %v1500_v43 = vmax.f32 %v4240_v30, %v1498_v53  ;;  %v1503_v25 = vmax.f32 %v4241_v11, %v1499_v41  ;;  %v4244_v11 = vld [vmem:[#allocation29_spill] sm:$0xff] }
 0x34f   :  { %v2198_v37 = vpack.i.bf16 %v1503_v25, %v1502_v12  ;;  %v2193_v56 = vpack.i.bf16 %v1501_v49, %v1500_v43 }
 0x351   :  { %2199 = vrot.lane.b32.xlu0 %v2198_v37, %s2234_s16  ;;  %2194 = vrot.lane.b32.xlu1 %v2193_v56, %s2234_s16  ;;  %v4245_v37 = vld [vmem:[#allocation30_spill] sm:$0xff]  ;;  %v4246_v56 = vld [vmem:[#allocation31_spill] sm:$0xff] }
 0x3bd   :  { %v2190_v42 = vpop.permute.xlu0 %2189  ;;  %v2185_v62 = vpop.permute.xlu1 %2184 }
 0x3be   :  { %v2192_v51 = vunpack.i.h.bf16 %v2190_v42  ;;  %v2191_v39 = vunpack.i.l.bf16 %v2190_v42  ;;  %v2187_v38 = vunpack.i.h.bf16 %v2185_v62  ;;  %v2186_v28 = vunpack.i.l.bf16 %v2185_v62  ;;  %v4249_v42 = vld [vmem:[#allocation34_spill] sm:$0xff]  ;;  %v4254_v62 = vld [vmem:[#allocation39_spill] sm:$0xff] }
 0x3c0   :  { %v1733_v31 = vsel %vm563_vm5, %v2191_v39, %v2192_v51  ;;  %v1734_v3 = vsel %vm563_vm5, %v2187_v38, %v2191_v39  ;;  %v1735_v26 = vsel %vm563_vm5, %v2186_v28, %v2187_v38  ;;  %v1736_v59 = vsel %vm563_vm5, %v2192_v51, %v2186_v28  ;;  %v4255_v51 = vld [vmem:[#allocation40_spill] sm:$0xff]  ;;  %v4256_v39 = vld [vmem:[#allocation41_spill] sm:$0xff]  ;;  %v4257_v38 = vld [vmem:[#allocation42_spill] sm:$0xff] }
 0x3c1   :  { %v3880_v4 = vmax.f32 %v3754_v22, %v1733_v31  ;;  %v3883_v55 = vmax.f32 %v3752_v32, %v1734_v3  ;;  %v3886_v29 = vmax.f32 %v3750_v7, %v1735_v26  ;;  %v3889_v44 = vmax.f32 %v3756_v34, %v1736_v59  ;;  %v4258_v28 = vld [vmem:[#allocation43_spill] sm:$0xff]  ;;  %v4259_v31 = vld [vmem:[#allocation44_spill] sm:$0xff]  ;;  %v4260_v3 = vld [vmem:[#allocation45_spill] sm:$0xff] }
 0x3c2   :  { %v4261_v26 = vld [vmem:[#allocation46_spill] sm:$0xff]  ;;  %v4262_v59 = vld [vmem:[#allocation47_spill] sm:$0xff] }
 0x3c3   :  { %v2200_v19 = vpop.permute.xlu0 %2199  ;;  %v2195_v20 = vpop.permute.xlu1 %2194  ;;  %v2208_v63 = vpack.i.bf16 %v3889_v44, %v3880_v4  ;;  %v2203_v6 = vpack.i.bf16 %v3883_v55, %v3886_v29 }
 0x3c4   :  { %v2202_v18 = vunpack.i.h.bf16 %v2200_v19  ;;  %v2201_v22 = vunpack.i.l.bf16 %v2200_v19  ;;  %v2197_v1 = vunpack.i.h.bf16 %v2195_v20  ;;  %v2196_v27 = vunpack.i.l.bf16 %v2195_v20  ;;  %v4263_v19 = vld [vmem:[#allocation48_spill] sm:$0xff]  ;;  %v4264_v20 = vld [vmem:[#allocation50_spill] sm:$0xff] }
 0x3c5   :  { %2209 = vrot.lane.b32.xlu0 %v2208_v63, %s2234_s16  ;;  %2204 = vrot.lane.b32.xlu1 %v2203_v6, %s2234_s16  ;;  %v4265_v63 = vld [vmem:[#allocation51_spill] sm:$0xff]  ;;  %v4266_v6 = vld [vmem:[#allocation52_spill] sm:$0xff] }
 0x3c6   :  { %v1512_v7 = vsel %vm723_vm7, %v2201_v22, %v2202_v18  ;;  %v1514_v32 = vsel %vm723_vm7, %v2196_v27, %v2197_v1  ;;  %v1513_v34 = vsel %vm723_vm7, %v2197_v1, %v2201_v22  ;;  %v1515_v23 = vsel %vm723_vm7, %v2202_v18, %v2196_v27  ;;  %v4267_v18 = vld [vmem:[#allocation53_spill] sm:$0xff]  ;;  %v4268_v22 = vld [vmem:[#allocation54_spill] sm:$0xff]  ;;  %v4269_v1 = vld [vmem:[#allocation55_spill] sm:$0xff] }
 0x3c7   :  { %v1518_v53 = vmax.f32 %v1502_v12, %v1512_v7  ;;  %v1516_v41 = vmax.f32 %v1500_v43, %v1514_v32  ;;  %v1517_v57 = vmax.f32 %v1501_v49, %v1513_v34  ;;  %v1519_v30 = vmax.f32 %v1503_v25, %v1515_v23  ;;  %v4250_v12 = vld [vmem:[#allocation35_spill] sm:$0xff]  ;;  %v4251_v49 = vld [vmem:[#allocation36_spill] sm:$0xff]  ;;  %v4252_v43 = vld [vmem:[#allocation37_spill] sm:$0xff] }
 0x3c8   :  { %v4253_v25 = vld [vmem:[#allocation38_spill] sm:$0xff]  ;;  %v4270_v27 = vld [vmem:[#allocation56_spill] sm:$0xff]  ;;  %v4271_v7 = vld [vmem:[#allocation57_spill] sm:$0xff] }
 0x3c9   :  { %1648 = vmatprep.mubr.f32.mxu0 %v1517_v57  ;;  %1718 = vmatprep.mubr.f32.mxu1 %v1519_v30  ;;  %v4272_v32 = vld [vmem:[#allocation58_spill] sm:$0xff]  ;;  %v4273_v34 = vld [vmem:[#allocation59_spill] sm:$0xff]  ;;  %v4274_v23 = vld [vmem:[#allocation60_spill] sm:$0xff] }
 0x3ca   :  { %1649 = vmatmul.mubr.f32.vlgmr.msra.gmra.mxu0 %v1516_v41  ;;  %1719 = vmatmul.mubr.f32.vlgmr.msra.gmra.mxu1 %v1518_v53  ;;  %v4275_v53 = vld [vmem:[#allocation61_spill] sm:$0xff]  ;;  %v4276_v41 = vld [vmem:[#allocation62_spill] sm:$0xff]  ;;  %v4277_v57 = vld [vmem:[#allocation63_spill] sm:$0xff] }
 0x3cb   :  { %2056 = vmatpush3.msra.mxu0 %v4244_v11  ;;  %2091 = vmatpush3.msra.mxu1 %v4245_v37  ;;  %v4278_v30 = vld [vmem:[#allocation64_spill] sm:$0xff]  ;;  %v4279_v11 = vld [vmem:[#allocation65_spill] sm:$0xff]  ;;  %v4280_v37 = vld [vmem:[#allocation66_spill] sm:$0xff] }
 0x3cc   :  { %2057 = vmatprep.subr.mxu0 %v4246_v56  ;;  %2092 = vmatprep.subr.mxu1 %v4247_v35  ;;  %v4281_v56 = vld [vmem:[#allocation67_spill] sm:$0xff] }
 0x3cd   :  { %2058 = vmatpush3.msra.mxu0 %v4248_v45  ;;  %2093 = vmatpush3.msra.mxu1 %v4249_v42 }
 0x3ce   :  { %2059 = vmatprep.subr.mxu0 %v4250_v12  ;;  %2094 = vmatprep.subr.mxu1 %v4251_v49 }
 0x3cf   :  { %2060 = vmatpush3.msra.mxu0 %v4252_v43  ;;  %2095 = vmatpush3.msra.mxu1 %v4253_v25 }
 0x3d0   :  { %2061 = vmatprep.subr.mxu0 %v4254_v62  ;;  %2096 = vmatprep.subr.mxu1 %v4255_v51 }
 0x3d1   :  { %2062 = vmatpush3.msra.mxu0 %v4256_v39  ;;  %2097 = vmatpush3.msra.mxu1 %v4257_v38 }
 0x3d2   :  { %2063 = vmatprep.subr.mxu0 %v4258_v28  ;;  %2098 = vmatprep.subr.mxu1 %v4259_v31 }
 0x3d3   :  { %2064 = vmatpush3.msra.mxu0 %v4260_v3  ;;  %2099 = vmatpush3.msra.mxu1 %v4261_v26 }
 0x3d4   :  { %2065 = vmatprep.subr.mxu0 %v4262_v59  ;;  %2100 = vmatprep.subr.mxu1 %v4263_v19 }
 0x3d5   :  { %2066 = vmatpush3.msra.mxu0 %v4264_v20  ;;  %2101 = vmatpush3.msra.mxu1 %v4265_v63 }
 0x3d6   :  { %2067 = vmatprep.subr.mxu0 %v4266_v6  ;;  %2102 = vmatprep.subr.mxu1 %v4267_v18 }
 0x3d7   :  { %2068 = vmatpush3.msra.mxu0 %v4268_v22  ;;  %2103 = vmatpush3.msra.mxu1 %v4269_v1 }
 0x3d8   :  { %2069 = vmatprep.subr.mxu0 %v4270_v27  ;;  %2104 = vmatprep.subr.mxu1 %v4271_v7 }
 0x3d9   :  { %2070 = vmatpush3.msra.mxu0 %v4272_v32  ;;  %2105 = vmatpush3.msra.mxu1 %v4273_v34 }
 0x3da   :  { %2071 = vmatprep.subr.mxu0 %v4274_v23  ;;  %2106 = vmatprep.subr.mxu1 %v4275_v53 }
 0x3db   :  { %2072 = vmatpush3.msra.mxu0 %v4276_v41  ;;  %2107 = vmatpush3.msra.mxu1 %v4277_v57 }
 0x3dc   :  { %2073 = vmatprep.subr.mxu0 %v4278_v30  ;;  %2108 = vmatprep.subr.mxu1 %v4279_v11 }
 0x3dd   :  { %2074 = vmatpush3.msra.mxu0 %v4280_v37  ;;  %2109 = vmatpush3.msra.mxu1 %v4281_v56 }
 0x3de   :  { %2075 = vmatprep.subr.mxu0 %v3682_v60  ;;  %2110 = vmatprep.subr.mxu1 %v3687_v10 }
 0x3df   :  { %2076 = vmatpush3.msra.mxu0 %v3692_v48  ;;  %2111 = vmatpush3.msra.mxu1 %v3699_v0 }
 0x3e0   :  { %2077 = vmatprep.subr.mxu0 %v3704_v36  ;;  %2112 = vmatprep.subr.mxu1 %v3709_v14 }
 0x3e1   :  { %2078 = vmatpush3.msra.mxu0 %v3716_v21  ;;  %2113 = vmatpush3.msra.mxu1 %v3721_v47 }
 0x3e2   :  { %2079 = vmatprep.subr.mxu0 %v3730_v46  ;;  %2114 = vmatprep.subr.mxu1 %v3735_v9 }
 0x3e3   :  { %2080 = vmatpush3.msra.mxu0 %v3741_v2  ;;  %2115 = vmatpush3.msra.mxu1 %v3746_v58 }
 0x3e4   :  { %2081 = vmatprep.subr.mxu0 %v3762_v15  ;;  %2116 = vmatprep.subr.mxu1 %v3767_v24 }
 0x3e5   :  { %2082 = vmatpush3.msra.mxu0 %v3772_v52  ;;  %2117 = vmatpush3.msra.mxu1 %v3781_v50 }
 0x3e6   :  { %2083 = vmatprep.subr.mxu0 %v3808_v5  ;;  %2118 = vmatprep.subr.mxu1 %v3813_v17 }
 0x3e7   :  { %2084 = vmatpush3.msra.mxu0 %v3820_v54  ;;  %2119 = vmatpush3.msra.mxu1 %v3825_v13 }
 0x3e8   :  { %2085 = vmatprep.subr.mxu0 %v3833_v16  ;;  %2120 = vmatprep.subr.mxu1 %v3838_v33 }
 0x3e9   :  { %2086 = vmatpush3.msra.mxu0 %v3851_v8  ;;  %2121 = vmatpush3.msra.mxu1 %v3856_v40 }
 0x437   :  { %v2210_v60 = vpop.permute.xlu0 %2209  ;;  %v2205_v10 = vpop.permute.xlu1 %2204 }
 0x438   :  { %v2212_v48 = vunpack.i.h.bf16 %v2210_v60  ;;  %v2211_v0 = vunpack.i.l.bf16 %v2210_v60  ;;  %v2207_v36 = vunpack.i.h.bf16 %v2205_v10  ;;  %v2206_v14 = vunpack.i.l.bf16 %v2205_v10 }
 0x43a   :  { %v1749_v21 = vsel %vm723_vm7, %v2211_v0, %v2212_v48  ;;  %v1751_v47 = vsel %vm723_vm7, %v2206_v14, %v2207_v36  ;;  %v1750_v46 = vsel %vm723_vm7, %v2207_v36, %v2211_v0  ;;  %v1752_v9 = vsel %vm723_vm7, %v2212_v48, %v2206_v14 }
 0x43b   :  { %v1755_v2 = vmax.f32 %v3880_v4, %v1749_v21  ;;  %v1753_v58 = vmax.f32 %v3886_v29, %v1751_v47  ;;  %v1754_v15 = vmax.f32 %v3883_v55, %v1750_v46  ;;  %v1756_v24 = vmax.f32 %v3889_v44, %v1752_v9 }
 0x43d   :  { %1885 = vmatprep.mubr.f32.mxu0 %v1754_v15  ;;  %1955 = vmatprep.mubr.f32.mxu1 %v1756_v24 }
 0x43e   :  { %1886 = vmatmul.mubr.f32.vlgmr.msra.gmra.mxu0 %v1753_v58  ;;  %1956 = vmatmul.mubr.f32.vlgmr.msra.gmra.mxu1 %v1755_v2 }
 0x48a   :  { %v2017_v52 = vpop.f32.mrf.mxu0  ;;  %v2052_v50 = vpop.f32.mrf.mxu1 }
 0x48c   :  { %v2018_v5 = vpop.f32.mrf.mxu0  ;;  %v2053_v17 = vpop.f32.mrf.mxu1 }
 0x48d   :  { %v2019_v54 = vadd.f32 %v2018_v5, %v2017_v52  ;;  %v2054_v13 = vadd.f32 %v2053_v17, %v2052_v50 }
 0x48f   :  { %v1721_v61 = vadd.f32 %v2054_v13, %v2019_v54 }
 0x491   :  { %1724 = vst [vmem:[%s3991_s6] sm:$0xff] %v1721_v61 }
 0x4fe   :  { %v2087_v16 = vpop.f32.mrf.mxu0  ;;  %v2122_v33 = vpop.f32.mrf.mxu1 }
 0x500   :  { %v2088_v8 = vpop.f32.mrf.mxu0  ;;  %v2123_v40 = vpop.f32.mrf.mxu1 }
 0x501   :  { %v2089_v4 = vadd.f32 %v2088_v8, %v2087_v16  ;;  %v2124_v55 = vadd.f32 %v2123_v40, %v2122_v33 }
 0x503   :  { %v1958_v29 = vadd.f32 %v2124_v55, %v2089_v4 }
 0x505   :  { %1961 = vst [vmem:[%s3991_s6 + $0x8] sm:$0xff] %v1958_v29 }

</bundles_post_ra>
